<compile_context>
chip_gen: v6e
topology: v6e:2x2x1
jax: 0.10.0
libtpu: 0.0.40
codegen_flags: <defaults>
</compile_context>

<pallas_src>
import math

import jax
import jax.numpy as jnp
from jax.experimental import pallas as pl
from jax.experimental.pallas import tpu as pltpu

D_IN, D_H1, D_H2, D_OUT = 1024, 512, 64, 3
D_OUT_PAD = 128  # lane-dense padded output width (kernel writes 128, wrapper keeps 3)


def mlp_kernel(x_ref, w1_ref, b1_ref, w2_ref, b2_ref, w3_ref, b3_ref, o_ref):
    # x_ref: (tb, 1024) f32 tile of the batch; cast to bf16 in-kernel (no extra
    # HBM pass in the wrapper). Weights are bf16, resident across grid steps.
    x = x_ref[...].astype(jnp.bfloat16)

    # Layer 1: (tb,1024) @ (1024,512) -> f32 accum, f32 bias, ReLU, back to bf16.
    h1 = jnp.dot(x, w1_ref[...], preferred_element_type=jnp.float32) + b1_ref[...]
    h1 = jnp.maximum(h1, 0.0).astype(jnp.bfloat16)

    # Layer 2: (tb,512) @ (512,64)
    h2 = jnp.dot(h1, w2_ref[...], preferred_element_type=jnp.float32) + b2_ref[...]
    h2 = jnp.maximum(h2, 0.0).astype(jnp.bfloat16)

    # Layer 3: (tb,64) @ (64,128)  (W3 zero-padded 3 -> 128 on the output dim)
    out = jnp.dot(h2, w3_ref[...], preferred_element_type=jnp.float32) + b3_ref[...]
    o_ref[...] = out.astype(o_ref.dtype)  # bf16 store (halves padded-out traffic)


def _round_up(n, m):
    return pl.cdiv(n, m) * m


def my_network_forward(x, params, *, tb=512):
    """x: (B, 1024) float32.  params: dict of w1,b1,w2,b2,w3,b3 (f32, [in,out])."""
    B = x.shape[0]
    assert x.shape[1] == D_IN

    # Tile choice: big tile for MXU / DMA efficiency, but never let it collapse
    # the grid to a single step when B allows >=2 (keeps both v7x TCs busy).
    # tb stays a multiple of 8 (sublane constraint); B need NOT divide tb —
    # the edge block is ragged and its OOB rows are dropped.
    tb = int(max(8, min(tb, _round_up(pl.cdiv(max(B, 1), 2), 8))))
    grid = (pl.cdiv(B, tb),)

    # Weights to bf16 (native MXU dtype); biases stay f32 (added post-accum).
    w1 = params["w1"].astype(jnp.bfloat16)
    w2 = params["w2"].astype(jnp.bfloat16)
    b1 = params["b1"].astype(jnp.float32)
    b2 = params["b2"].astype(jnp.float32)
    # Pad the last layer's output dim 3 -> 128 so the kernel's output block is
    # lane-dense (unmasked stores); extra columns are exactly zero weights/bias.
    w3 = jnp.zeros((D_H2, D_OUT_PAD), jnp.bfloat16)
    w3 = w3.at[:, :D_OUT].set(params["w3"].astype(jnp.bfloat16))
    b3 = jnp.zeros((1, D_OUT_PAD), jnp.float32)
    b3 = b3.at[:, :D_OUT].set(params["b3"].astype(jnp.float32))

    rep2 = lambda i: (0, 0)  # weights/biases: same block for every grid step

    out_padded = pl.pallas_call(
        mlp_kernel,
        out_shape=jax.ShapeDtypeStruct((B, D_OUT_PAD), jnp.bfloat16),
        grid_spec=pltpu.PrefetchScalarGridSpec(
            num_scalar_prefetch=0,
            grid=grid,
            in_specs=[
                pl.BlockSpec((tb, D_IN), lambda i: (i, 0)),   # x tile (ragged edge OK)
                pl.BlockSpec((D_IN, D_H1), rep2),             # w1
                pl.BlockSpec((1, D_H1), rep2),                # b1
                pl.BlockSpec((D_H1, D_H2), rep2),             # w2
                pl.BlockSpec((1, D_H2), rep2),                # b2
                pl.BlockSpec((D_H2, D_OUT_PAD), rep2),        # w3 (padded)
                pl.BlockSpec((1, D_OUT_PAD), rep2),           # b3 (padded)
            ],
            out_specs=pl.BlockSpec((tb, D_OUT_PAD), lambda i: (i, 0)),
        ),
        compiler_params=pltpu.CompilerParams(
            dimension_semantics=("parallel",),
        ),
    )(x, w1, b1, w2, b2, w3, b3)

    # Drop the lane padding of the 3-wide output; return f32 like the module.
    return out_padded[:, :D_OUT].astype(jnp.float32)


def init_params(key):
    """Deterministic init mimicking PyTorch nn.Linear: U(-1/sqrt(fan_in), +)."""
    def linear(k, fan_in, fan_out):
        kw, kb = jax.random.split(k)
        bound = 1.0 / math.sqrt(fan_in)
        # stored as [in, out] so forward is x @ W + b
        w = jax.random.uniform(kw, (fan_in, fan_out), jnp.float32, -bound, bound)
        b = jax.random.uniform(kb, (1, fan_out), jnp.float32, -bound, bound)
        return w, b

    k1, k2, k3 = jax.random.split(key, 3)
    w1, b1 = linear(k1, D_IN, D_H1)
    w2, b2 = linear(k2, D_H1, D_H2)
    w3, b3 = linear(k3, D_H2, D_OUT)
    return {"w1": w1, "b1": b1, "w2": w2, "b2": b2, "w3": w3, "b3": b3}


def reference_forward(x, p):
    """Pure-JAX reference matching the kernel's numerics (bf16 matmuls, f32 accum)."""
    bf = jnp.bfloat16
    h1 = jnp.dot(x.astype(bf), p["w1"].astype(bf),
                 preferred_element_type=jnp.float32) + p["b1"]
    h1 = jnp.maximum(h1, 0.0).astype(bf)
    h2 = jnp.dot(h1, p["w2"].astype(bf),
                 preferred_element_type=jnp.float32) + p["b2"]
    h2 = jnp.maximum(h2, 0.0).astype(bf)
    return jnp.dot(h2, p["w3"].astype(bf),
                   preferred_element_type=jnp.float32) + p["b3"]


if __name__ == "__main__":
    key = jax.random.PRNGKey(0)
    kx, kp, kx2 = jax.random.split(key, 3)

    params = init_params(kp)

    # Small batch: tb clamps to 8 -> 2-step grid (exercises multi-step + both TCs).
    B = 16
    x = jax.random.normal(kx, (B, D_IN), jnp.float32)
    out = jax.block_until_ready(my_network_forward(x, params))
    ref = reference_forward(x, params)
    assert out.shape == (B, D_OUT)
    assert jnp.allclose(out, ref, atol=2e-2, rtol=2e-2)

    # Ragged batch: B not a multiple of the tile -> edge block with OOB rows
    # (dropped on store), exercises the no-pad ragged path.
    B2 = 13
    x2 = jax.random.normal(kx2, (B2, D_IN), jnp.float32)
    out2 = jax.block_until_ready(my_network_forward(x2, params))
    ref2 = reference_forward(x2, params)
    assert out2.shape == (B2, D_OUT)
    assert jnp.allclose(out2, ref2, atol=2e-2, rtol=2e-2)

    print("KERNEL_OK")
</pallas_src>

<mosaic_0001>
module attributes {stable_mosaic.version = 11 : i64} {
  func.func @mlp_kernel(%arg0: i32, %arg1: memref<8x1024xf32, #tpu.memory_space<vmem>>, %arg2: memref<1024x512xbf16, #tpu.memory_space<vmem>>, %arg3: memref<1x512xf32, #tpu.memory_space<vmem>>, %arg4: memref<512x64xbf16, #tpu.memory_space<vmem>>, %arg5: memref<1x64xf32, #tpu.memory_space<vmem>>, %arg6: memref<64x128xbf16, #tpu.memory_space<vmem>>, %arg7: memref<1x128xf32, #tpu.memory_space<vmem>>, %arg8: memref<8x128xbf16, #tpu.memory_space<vmem>>) attributes {dimension_semantics = [#tpu.dimension_semantics<parallel>], iteration_bounds = array<i64: 2>, scalar_prefetch = 0 : i64, scratch_operands = 0 : i64, tpu.core_type = #tpu.core_type<tc>, window_params = [{transform_indices = @transform_0, window_bounds = array<i64: 8, 1024>}, {pipeline_mode = #tpu.pipeline_mode<synchronous>, transform_indices = @transform_1, window_bounds = array<i64: 1024, 512>}, {pipeline_mode = #tpu.pipeline_mode<synchronous>, transform_indices = @transform_2, window_bounds = array<i64: 1, 512>}, {pipeline_mode = #tpu.pipeline_mode<synchronous>, transform_indices = @transform_3, window_bounds = array<i64: 512, 64>}, {pipeline_mode = #tpu.pipeline_mode<synchronous>, transform_indices = @transform_4, window_bounds = array<i64: 1, 64>}, {pipeline_mode = #tpu.pipeline_mode<synchronous>, transform_indices = @transform_5, window_bounds = array<i64: 64, 128>}, {pipeline_mode = #tpu.pipeline_mode<synchronous>, transform_indices = @transform_6, window_bounds = array<i64: 1, 128>}, {transform_indices = @transform_7, window_bounds = array<i64: 8, 128>}]} {
    %c0 = arith.constant 0 : index
    %c0_0 = arith.constant 0 : index
    %0 = vector.load %arg1[%c0, %c0_0] : memref<8x1024xf32, #tpu.memory_space<vmem>>, vector<8x1024xf32>
    %1 = arith.truncf %0 : vector<8x1024xf32> to vector<8x1024xbf16>
    %c0_1 = arith.constant 0 : index
    %c0_2 = arith.constant 0 : index
    %2 = vector.load %arg2[%c0_1, %c0_2] : memref<1024x512xbf16, #tpu.memory_space<vmem>>, vector<1024x512xbf16>
    %cst = arith.constant dense<0.000000e+00> : vector<8x512xf32>
    %3 = tpu.matmul %1, %2, %cst {dimension_numbers = #tpu.dot_dimension_numbers<[1], [0], [0], [1], [0, 0, 1, 1], [], []>} : vector<8x1024xbf16>, vector<1024x512xbf16>, vector<8x512xf32> -> vector<8x512xf32>
    %c0_3 = arith.constant 0 : index
    %c0_4 = arith.constant 0 : index
    %4 = vector.load %arg3[%c0_3, %c0_4] : memref<1x512xf32, #tpu.memory_space<vmem>>, vector<1x512xf32>
    %5 = vector.broadcast %4 : vector<1x512xf32> to vector<8x512xf32>
    %6 = arith.addf %3, %5 : vector<8x512xf32>
    %cst_5 = arith.constant 0.000000e+00 : f32
    %7 = vector.broadcast %cst_5 : f32 to vector<8x512xf32>
    %8 = arith.maximumf %6, %7 : vector<8x512xf32>
    %9 = arith.truncf %8 : vector<8x512xf32> to vector<8x512xbf16>
    %c0_6 = arith.constant 0 : index
    %c0_7 = arith.constant 0 : index
    %10 = vector.load %arg4[%c0_6, %c0_7] : memref<512x64xbf16, #tpu.memory_space<vmem>>, vector<512x64xbf16>
    %cst_8 = arith.constant dense<0.000000e+00> : vector<8x64xf32>
    %11 = tpu.matmul %9, %10, %cst_8 {dimension_numbers = #tpu.dot_dimension_numbers<[1], [0], [0], [1], [0, 0, 1, 1], [], []>} : vector<8x512xbf16>, vector<512x64xbf16>, vector<8x64xf32> -> vector<8x64xf32>
    %c0_9 = arith.constant 0 : index
    %c0_10 = arith.constant 0 : index
    %12 = vector.load %arg5[%c0_9, %c0_10] : memref<1x64xf32, #tpu.memory_space<vmem>>, vector<1x64xf32>
    %13 = vector.broadcast %12 : vector<1x64xf32> to vector<8x64xf32>
    %14 = arith.addf %11, %13 : vector<8x64xf32>
    %cst_11 = arith.constant 0.000000e+00 : f32
    %15 = vector.broadcast %cst_11 : f32 to vector<8x64xf32>
    %16 = arith.maximumf %14, %15 : vector<8x64xf32>
    %17 = arith.truncf %16 : vector<8x64xf32> to vector<8x64xbf16>
    %c0_12 = arith.constant 0 : index
    %c0_13 = arith.constant 0 : index
    %18 = vector.load %arg6[%c0_12, %c0_13] : memref<64x128xbf16, #tpu.memory_space<vmem>>, vector<64x128xbf16>
    %cst_14 = arith.constant dense<0.000000e+00> : vector<8x128xf32>
    %19 = tpu.matmul %17, %18, %cst_14 {dimension_numbers = #tpu.dot_dimension_numbers<[1], [0], [0], [1], [0, 0, 1, 1], [], []>} : vector<8x64xbf16>, vector<64x128xbf16>, vector<8x128xf32> -> vector<8x128xf32>
    %c0_15 = arith.constant 0 : index
    %c0_16 = arith.constant 0 : index
    %20 = vector.load %arg7[%c0_15, %c0_16] : memref<1x128xf32, #tpu.memory_space<vmem>>, vector<1x128xf32>
    %21 = vector.broadcast %20 : vector<1x128xf32> to vector<8x128xf32>
    %22 = arith.addf %19, %21 : vector<8x128xf32>
    %23 = arith.truncf %22 : vector<8x128xf32> to vector<8x128xbf16>
    %c0_17 = arith.constant 0 : index
    %c0_18 = arith.constant 0 : index
    %24 = vector.load %arg8[%c0_17, %c0_18] : memref<8x128xbf16, #tpu.memory_space<vmem>>, vector<8x128xbf16>
    tpu.vector_store %arg8[%c0_17, %c0_18], %23 {strides = array<i32>} : memref<8x128xbf16, #tpu.memory_space<vmem>>, vector<8x128xbf16>,
    return
  }
  func.func @transform_0(%arg0: i32) -> (i32, i32) {
    %c0_i32 = arith.constant 0 : i32
    %c0_i32_0 = arith.constant 0 : i32
    return %arg0, %c0_i32 : i32, i32
  }
  func.func @transform_1(%arg0: i32) -> (i32, i32) {
    %c0_i32 = arith.constant 0 : i32
    %c0_i32_0 = arith.constant 0 : i32
    %c0_i32_1 = arith.constant 0 : i32
    return %c0_i32, %c0_i32_0 : i32, i32
  }
  func.func @transform_2(%arg0: i32) -> (i32, i32) {
    %c0_i32 = arith.constant 0 : i32
    %c0_i32_0 = arith.constant 0 : i32
    %c0_i32_1 = arith.constant 0 : i32
    return %c0_i32, %c0_i32_0 : i32, i32
  }
  func.func @transform_3(%arg0: i32) -> (i32, i32) {
    %c0_i32 = arith.constant 0 : i32
    %c0_i32_0 = arith.constant 0 : i32
    %c0_i32_1 = arith.constant 0 : i32
    return %c0_i32, %c0_i32_0 : i32, i32
  }
  func.func @transform_4(%arg0: i32) -> (i32, i32) {
    %c0_i32 = arith.constant 0 : i32
    %c0_i32_0 = arith.constant 0 : i32
    %c0_i32_1 = arith.constant 0 : i32
    return %c0_i32, %c0_i32_0 : i32, i32
  }
  func.func @transform_5(%arg0: i32) -> (i32, i32) {
    %c0_i32 = arith.constant 0 : i32
    %c0_i32_0 = arith.constant 0 : i32
    %c0_i32_1 = arith.constant 0 : i32
    return %c0_i32, %c0_i32_0 : i32, i32
  }
  func.func @transform_6(%arg0: i32) -> (i32, i32) {
    %c0_i32 = arith.constant 0 : i32
    %c0_i32_0 = arith.constant 0 : i32
    %c0_i32_1 = arith.constant 0 : i32
    return %c0_i32, %c0_i32_0 : i32, i32
  }
  func.func @transform_7(%arg0: i32) -> (i32, i32) {
    %c0_i32 = arith.constant 0 : i32
    %c0_i32_0 = arith.constant 0 : i32
    return %arg0, %c0_i32 : i32, i32
  }
}

</mosaic_0001>

<bundles_post_ra>
// kernel: tpu_custom_call.1
= control target key start
LH: loop header
LB: loop body
LE: loop exit
PB: predicated region body
PF: predicated region fallthrough
CT: control target
= control target key end

     0   :  { %12 = vsyncpa [#allocation3], 0  ;;  %s3985_s0 = inlined_call_operand.vmem [shape: f32[16,1024], index: 0, kind: input, shape index: {}]   ;;  %s3986_s1 = inlined_call_operand.hbm [shape: bf16[1024,512], index: 1, kind: input, shape index: {}]   ;;  %s3987_s2 = inlined_call_operand.vmem [shape: f32[1,512], index: 2, kind: input, shape index: {}]   ;;  %s3988_s3 = inlined_call_operand.vmem [shape: bf16[512,64], index: 3, kind: input, shape index: {}]   ;;  %s3989_s4 = inlined_call_operand.vmem [shape: f32[1,64], index: 4, kind: input, shape index: {}]   ;;  %s3990_s5 = inlined_call_operand.vmem [shape: bf16[64,128], index: 5, kind: input, shape index: {}]   ;;  %s3991_s6 = inlined_call_operand.vmem [shape: f32[1,128], index: 6, kind: input, shape index: {}]   ;;  %s3992_s7 = inlined_call_operand.hbm [shape: bf16[16,128], index: 7, kind: output, shape index: {}]  }
   0x1   :  { %13 = vsyncpa [#allocation4], 0 }
   0x2   :  { %15 = vsyncpa [#allocation4 + $0x1], 0  ;;  %s3700_s24 = smov 0   ;;  %s3702_s25 = smov 0  }
   0x3   :  { %s3704_s26 = smov 0   ;;  %s3706_s27 = smov 0  }
   0x4 LB: > { %s3721_s28 = sadd.s32 4294967295, %s3652_s27   ;;  %s2718_s29 = sadd.s32 4294967294, %s3652_s27   ;;  %s3652_s27 = sphi %s3706_s27, %s4000_s27   ;;  %s3648_s26 = sphi %s3704_s26, %s3999_s26   ;;  %s3644_s25 = sphi %s3702_s25, %s3998_s25   ;;  %s3640_s24 = sphi %s3700_s24, %s3997_s24  }
   0x5   : > { %s3725_s30 = sadd.s32 1, %s3652_s27   ;;  %s180_s8 = sadd.s32 1, %s3648_s26 }
   0x6   : > { %s177_s9 = ssub.s32 %s3652_s27, %s3725_s30  ;;  %p190_p0 = scmp.ne.s32.totalorder %s3648_s26, %s3644_s25 }
   0x7   : > { %p178_p1 = scmp.eq.s32.totalorder %s177_s9, 0  ;;  %p191_p2 = scmp.eq.s32.totalorder %s3721_s28, 1 }
   0x8   : > { %p196_p3 = scmp.ne.s32.totalorder %s3644_s25, %s3640_s24  ;;  %p197_p4 = scmp.eq.s32.totalorder %s2718_s29, 1 }
   0x9   : > { %s3736_s10 = scalar_select %p178_p1, %s3648_s26, %s180_s8  }
   0xa   : > { %p3738_p5 = por %p191_p2, %p190_p0  ;;  %p3742_p6 = por %p197_p4, %p196_p3 }
   0xb   : > { %p2719_p7 = scmp.ge.s32.totalorder %s3652_s27, 1  ;;  %p204_p8 = scmp.lt.s32.totalorder %s3652_s27, 3 }
   0xc   : > { %s3994_s12 = scalar_select %p3742_p6, 1, 0 }
   0xd   : > { %p3102_p9 = scmp.eq.s32.totalorder %s3721_s28, 0  ;;  %p3749_p10 = pnand %p2719_p7, %p204_p8 }
   0xe   : > { %s3654_s14 = smov [#allocation2]  }
   0xf   : > { %s216_s15 = sshll.u32 %s3654_s14, 4  ;;  %p3094_p11 = pneg %p3749_p10  ;;  %s217_s15 = int_to_ptr.vmem [resolvable:$true] %s216_s15 }
  0x10   : > { %s3573_s16 = scalar_lea.vmem %s217_s15, 32768  ;;  %p3581_p3 = scmp.lt.s32.totalorder %s217_s15, %s217_s15 }
  0x11   : > { %p3095_p12 = pnand %p3102_p9, %p3094_p11  ;;  %p3574_p0 = scmp.ne.s32.totalorder %s217_s15, %s3573_s16 }
  0x12   : > { %p3582_p4 = scmp.lt.s32.totalorder %s3573_s16, %s3573_s16 }
  0x13   : > { %p3564_p13 = pneg %p3095_p12 }
  0x14   : > { %p3583_p6 = por %p3582_p4, %p3581_p3 }
  0x15   : > { %p3576_p1 = pnand %p3574_p0, %p3564_p13 }
  0x17   : > { %p3577_p2 = pneg %p3576_p1 }
  0x19   : > { %p3584_p7 = pnand %p3583_p6, %p3577_p2 }
  0x1b   : > { %3587 = shalt.err (!%p3584_p7)
}
  0x1c   : > { %s3655_s17 = smov 256   ;;  %s3656_s18 = smov 16  }
  0x1d   : > { %3097 = dma.hbm_to_vmem [thread:$0]  (!%p3095_p12), %s3986_s1, 32768, %s217_s15, [#allocation3], %s3655_s17, %s3655_s17, %s3656_s18  }
  0x1e   : > { %255 = sbr.rel (%p3749_p10) target bundleno = 911 (0x38f), region = 48 }
  0x23   : > { %3631 = dma.done.wait (%p3102_p9), [#allocation3], 32768  }
  0x24   : > { %3633 = vsyncadd (%p3102_p9), [#allocation3], 4294934528  ;;  %v3142_v0 = vld [vmem:[#allocation2 + $0xe4] ss:$16 sps:$4 sm:$0xff]   ;;  %v3146_v2 = vld [vmem:[#allocation2 + $0xe0] ss:$16 sps:$4 sm:$0xff]  }
  0x25   : > { %v3144_v1 = vld [vmem:[#allocation2 + $0x2e4] ss:$16 sps:$4 sm:$0xff]   ;;  %1867 = vmatprep.subr.bf16.mxu0 %v3142_v0  ;;  %v3147_v3 = vld [vmem:[#allocation2 + $0x2e0] ss:$16 sps:$4 sm:$0xff]   ;;  %p287_p6 = scmp.lt.s32.totalorder %s3721_s28, 1  ;;  %vm3658_vm0 = vmmov 0  }
  0x26   : > { %1908 = vmatprep.subr.bf16.mxu1 %v3144_v1  ;;  %v3148_v4 = vld [vmem:[#allocation2 + $0xc4] ss:$16 sps:$4 sm:$0xff]   ;;  %1868 = vmatpush1.bf16.msra.mxu0 %v3146_v2  ;;  %v3152_v6 = vld [vmem:[#allocation2 + $0xc0] ss:$16 sps:$4 sm:$0xff]   ;;  %vm2587_vm1 = vcmask 523264   ;;  %s284_s18 = sand.u32 1, %s3644_s25  }
  0x27   : > { %1909 = vmatpush1.bf16.msra.mxu1 %v3147_v3  ;;  %v3150_v5 = vld [vmem:[#allocation2 + $0x2c4] ss:$16 sps:$4 sm:$0xff]   ;;  %1869 = vmatprep.subr.bf16.mxu0 %v3148_v4  ;;  %v3153_v7 = vld [vmem:[#allocation2 + $0x2c0] ss:$16 sps:$4 sm:$0xff]   ;;  %s288_s21 = scalar_select %p287_p6, %s3721_s28, 1 }
  0x28   : > { %1910 = vmatprep.subr.bf16.mxu1 %v3150_v5  ;;  %v3154_v8 = vld [vmem:[#allocation2 + $0xa4] ss:$16 sps:$4 sm:$0xff]   ;;  %v3158_v10 = vld [vmem:[#allocation2 + $0xa0] ss:$16 sps:$4 sm:$0xff]   ;;  %s2724_s19 = sshll.u32 %s284_s18, 2  ;;  %s2634_s14 = scalar_lea.sflag [#allocation4], %s284_s18 }
  0x29   : > { %v3156_v9 = vld [vmem:[#allocation2 + $0x2a4] ss:$16 sps:$4 sm:$0xff]   ;;  %v3159_v11 = vld [vmem:[#allocation2 + $0x2a0] ss:$16 sps:$4 sm:$0xff]   ;;  %s3026_s22 = sshll.u32 %s288_s21, 6  ;;  %s286_s23 = scalar_lea.vmem [#allocation5], %s2724_s19 }
  0x2a   : > { %1870 = vmatpush1.bf16.msra.mxu0 %v3152_v6  ;;  %v3160_v12 = vld [vmem:[#allocation2 + $0x84] ss:$16 sps:$4 sm:$0xff]   ;;  %v3164_v14 = vld [vmem:[#allocation2 + $0x80] ss:$16 sps:$4 sm:$0xff]   ;;  %s3771_s8 = scalar_lea.vmem %s3985_s0, %s3026_s22  ;;  %s3023_s22 = sshll.u32 %s3721_s28, 6 }
  0x2b   : > { %1911 = vmatpush1.bf16.msra.mxu1 %v3153_v7  ;;  %1871 = vmatprep.subr.bf16.mxu0 %v3154_v8  ;;  %v3162_v13 = vld [vmem:[#allocation2 + $0x284] ss:$16 sps:$4 sm:$0xff]   ;;  %v3165_v15 = vld [vmem:[#allocation2 + $0x280] ss:$16 sps:$4 sm:$0xff]   ;;  %v294_v46 = vld [vmem:[%s3771_s8 + $0x8] sm:$0xff]  ;;  %s2647_s29 = sshll.u32 %s286_s23, 4  ;;  %s3944_s13 = scalar_lea.hbm %s3992_s7, %s3023_s22  ;;  %s3946_s29 = int_to_ptr.vmem [resolvable:$true] %s2647_s29 }
  0x2c   : > { %1912 = vmatprep.subr.bf16.mxu1 %v3156_v9  ;;  %v3166_v16 = vld [vmem:[#allocation2 + $0x64] ss:$16 sps:$4 sm:$0xff]   ;;  %v3170_v18 = vld [vmem:[#allocation2 + $0x60] ss:$16 sps:$4 sm:$0xff]   ;;  %v3774_v49 = vpack.c.bf16 %v294_v46, %v294_v46  ;;  %v296_v50 = vld [vmem:[%s3771_s8 + $0x18] sm:$0xff]  ;;  %s3588_s28 = scalar_lea.vmem %s3946_s29, 64 }
  0x2d   : > { %v3168_v17 = vld [vmem:[#allocation2 + $0x264] ss:$16 sps:$4 sm:$0xff]   ;;  %v3171_v19 = vld [vmem:[#allocation2 + $0x260] ss:$16 sps:$4 sm:$0xff]   ;;  %v3777_v52 = vpack.c.bf16 %v296_v50, %v296_v50  ;;  %p3589_p8 = scmp.ne.s32.totalorder %s3946_s29, %s3588_s28  ;;  %s3659_s15 = smov [#allocation5]  }
  0x2e   : > { %1872 = vmatpush1.bf16.msra.mxu0 %v3158_v10  ;;  %v3172_v20 = vld [vmem:[#allocation2 + $0x44] ss:$16 sps:$4 sm:$0xff]   ;;  %v3176_v22 = vld [vmem:[#allocation2 + $0x40] ss:$16 sps:$4 sm:$0xff]   ;;  %1899 = vmatprep.mubr.bf16.mxu0 %v3774_v49  ;;  %s3592_s16 = sshll.u32 %s3659_s15, 4  ;;  %s3593_s16 = int_to_ptr.vmem [resolvable:$false] %s3592_s16 }
  0x2f   : > { %1913 = vmatpush1.bf16.msra.mxu1 %v3159_v11  ;;  %1873 = vmatprep.subr.bf16.mxu0 %v3160_v12  ;;  %v3174_v21 = vld [vmem:[#allocation2 + $0x244] ss:$16 sps:$4 sm:$0xff]   ;;  %v3177_v23 = vld [vmem:[#allocation2 + $0x240] ss:$16 sps:$4 sm:$0xff]   ;;  %p3590_p9 = pnand %p3589_p8, %p3738_p5  ;;  %s3594_s17 = scalar_lea.vmem %s3593_s16, 128 }
  0x30   : > { %1914 = vmatprep.subr.bf16.mxu1 %v3162_v13  ;;  %v3178_v24 = vld [vmem:[#allocation2 + $0x24] ss:$16 sps:$4 sm:$0xff]   ;;  %v3182_v26 = vld [vmem:[#allocation2 + $0x20] ss:$16 sps:$4 sm:$0xff]   ;;  %1940 = vmatprep.mubr.bf16.mxu1 %v3777_v52  ;;  %p3595_p11 = scmp.lt.s32.totalorder %s3946_s29, %s3593_s16  ;;  %p3596_p12 = scmp.lt.s32.totalorder %s3594_s17, %s3588_s28 }
  0x31   : > { %v3180_v25 = vld [vmem:[#allocation2 + $0x224] ss:$16 sps:$4 sm:$0xff]   ;;  %v3183_v27 = vld [vmem:[#allocation2 + $0x220] ss:$16 sps:$4 sm:$0xff]   ;;  %p3591_p10 = pneg %p3590_p9 }
  0x32   : > { %1874 = vmatpush1.bf16.msra.mxu0 %v3164_v14  ;;  %v3184_v28 = vld [vmem:[#allocation2 + $0x4] ss:$16 sps:$4 sm:$0xff]   ;;  %v3188_v30 = vld [vmem:[#allocation2] ss:$16 sps:$4 sm:$0xff]   ;;  %p3597_p13 = por %p3596_p12, %p3595_p11 }
  0x33   : > { %1915 = vmatpush1.bf16.msra.mxu1 %v3165_v15  ;;  %1875 = vmatprep.subr.bf16.mxu0 %v3166_v16  ;;  %v3186_v29 = vld [vmem:[#allocation2 + $0x204] ss:$16 sps:$4 sm:$0xff]   ;;  %v3189_v31 = vld [vmem:[#allocation2 + $0x200] ss:$16 sps:$4 sm:$0xff]  }
  0x34   : > { %1916 = vmatprep.subr.bf16.mxu1 %v3168_v17  ;;  %v3190_v32 = vld [vmem:[#allocation2 + $0x1e4] ss:$16 sps:$4 sm:$0xff]   ;;  %v3194_v34 = vld [vmem:[#allocation2 + $0x1e0] ss:$16 sps:$4 sm:$0xff]   ;;  %p3598_p0 = pnand %p3597_p13, %p3591_p10 }
  0x35   : > { %v3192_v33 = vld [vmem:[#allocation2 + $0x3e4] ss:$16 sps:$4 sm:$0xff]   ;;  %v3195_v35 = vld [vmem:[#allocation2 + $0x3e0] ss:$16 sps:$4 sm:$0xff]  }
  0x36   : > { %1876 = vmatpush1.bf16.msra.mxu0 %v3170_v18  ;;  %v3196_v36 = vld [vmem:[#allocation2 + $0x1c4] ss:$16 sps:$4 sm:$0xff]   ;;  %v3200_v38 = vld [vmem:[#allocation2 + $0x1c0] ss:$16 sps:$4 sm:$0xff]  }
  0x37   : > { %1917 = vmatpush1.bf16.msra.mxu1 %v3171_v19  ;;  %1877 = vmatprep.subr.bf16.mxu0 %v3172_v20  ;;  %v3198_v37 = vld [vmem:[#allocation2 + $0x3c4] ss:$16 sps:$4 sm:$0xff]   ;;  %v3201_v39 = vld [vmem:[#allocation2 + $0x3c0] ss:$16 sps:$4 sm:$0xff]  }
  0x38   : > { %1918 = vmatprep.subr.bf16.mxu1 %v3174_v21  ;;  %v3202_v40 = vld [vmem:[#allocation2 + $0x1a4] ss:$16 sps:$4 sm:$0xff]   ;;  %v3206_v42 = vld [vmem:[#allocation2 + $0x1a0] ss:$16 sps:$4 sm:$0xff]  }
  0x39   : > { %v3204_v41 = vld [vmem:[#allocation2 + $0x3a4] ss:$16 sps:$4 sm:$0xff]   ;;  %v3207_v43 = vld [vmem:[#allocation2 + $0x3a0] ss:$16 sps:$4 sm:$0xff]  }
  0x3a   : > { %1878 = vmatpush1.bf16.msra.mxu0 %v3176_v22  ;;  %v3208_v44 = vld [vmem:[#allocation2 + $0x184] ss:$16 sps:$4 sm:$0xff]   ;;  %v3212_v47 = vld [vmem:[#allocation2 + $0x180] ss:$16 sps:$4 sm:$0xff]  }
  0x3b   : > { %1919 = vmatpush1.bf16.msra.mxu1 %v3177_v23  ;;  %1879 = vmatprep.subr.bf16.mxu0 %v3178_v24  ;;  %v3210_v45 = vld [vmem:[#allocation2 + $0x384] ss:$16 sps:$4 sm:$0xff]   ;;  %v3213_v48 = vld [vmem:[#allocation2 + $0x380] ss:$16 sps:$4 sm:$0xff]  }
  0x3c   : > { %1920 = vmatprep.subr.bf16.mxu1 %v3180_v25  ;;  %v3214_v51 = vld [vmem:[#allocation2 + $0x164] ss:$16 sps:$4 sm:$0xff]   ;;  %v3218_v54 = vld [vmem:[#allocation2 + $0x160] ss:$16 sps:$4 sm:$0xff]  }
  0x3d   : > { %v3216_v53 = vld [vmem:[#allocation2 + $0x364] ss:$16 sps:$4 sm:$0xff]   ;;  %v3219_v55 = vld [vmem:[#allocation2 + $0x360] ss:$16 sps:$4 sm:$0xff]  }
  0x3e   : > { %1880 = vmatpush1.bf16.msra.mxu0 %v3182_v26  ;;  %v3220_v56 = vld [vmem:[#allocation2 + $0x144] ss:$16 sps:$4 sm:$0xff]   ;;  %v3224_v58 = vld [vmem:[#allocation2 + $0x140] ss:$16 sps:$4 sm:$0xff]  }
  0x3f   : > { %1921 = vmatpush1.bf16.msra.mxu1 %v3183_v27  ;;  %1881 = vmatprep.subr.bf16.mxu0 %v3184_v28  ;;  %v3222_v57 = vld [vmem:[#allocation2 + $0x344] ss:$16 sps:$4 sm:$0xff]   ;;  %v3225_v59 = vld [vmem:[#allocation2 + $0x340] ss:$16 sps:$4 sm:$0xff]  }
  0x40   : > { %1922 = vmatprep.subr.bf16.mxu1 %v3186_v29  ;;  %v3226_v60 = vld [vmem:[#allocation2 + $0x124] ss:$16 sps:$4 sm:$0xff]   ;;  %v3230_v62 = vld [vmem:[#allocation2 + $0x120] ss:$16 sps:$4 sm:$0xff]  }
  0x41   : > { %v3228_v61 = vld [vmem:[#allocation2 + $0x324] ss:$16 sps:$4 sm:$0xff]   ;;  %v3231_v63 = vld [vmem:[#allocation2 + $0x320] ss:$16 sps:$4 sm:$0xff]  }
  0x42   : > { %1882 = vmatpush1.bf16.msra.mxu0 %v3188_v30  ;;  %v3232_v0 = vld [vmem:[#allocation2 + $0x104] ss:$16 sps:$4 sm:$0xff]   ;;  %v3236_v2 = vld [vmem:[#allocation2 + $0x100] ss:$16 sps:$4 sm:$0xff]  }
  0x43   : > { %1923 = vmatpush1.bf16.msra.mxu1 %v3189_v31  ;;  %1883 = vmatprep.subr.bf16.mxu0 %v3190_v32  ;;  %v3234_v1 = vld [vmem:[#allocation2 + $0x304] ss:$16 sps:$4 sm:$0xff]   ;;  %v3237_v3 = vld [vmem:[#allocation2 + $0x300] ss:$16 sps:$4 sm:$0xff]  }
  0x44   : > { %1924 = vmatprep.subr.bf16.mxu1 %v3192_v33  ;;  %v293_v4 = vld [vmem:[%s3771_s8] sm:$0xff]  ;;  %v295_v5 = vld [vmem:[%s3771_s8 + $0x10] sm:$0xff] }
  0x45   : > { %v3240_v6 = vld [vmem:[#allocation2 + $0x4e4] ss:$16 sps:$4 sm:$0xff]   ;;  %v3783_v8 = vpack.c.bf16 %v293_v4, %v293_v4  ;;  %v3785_v9 = vpack.c.bf16 %v295_v5, %v295_v5  ;;  %v3238_v10 = vld [vmem:[#allocation2 + $0x4e0] ss:$16 sps:$4 sm:$0xff]  }
  0x46   : > { %1884 = vmatpush2.bf16.msra.mxu0 %v3194_v34  ;;  %v3243_v7 = vld [vmem:[#allocation2 + $0x6e4] ss:$16 sps:$4 sm:$0xff]   ;;  %v3241_v11 = vld [vmem:[#allocation2 + $0x6e0] ss:$16 sps:$4 sm:$0xff]   ;;  %v298_v34 = vld [vmem:[%s3771_s8 + $0x28] sm:$0xff] }
  0x47   : > { %1925 = vmatpush2.bf16.msra.mxu1 %v3195_v35  ;;  %1885 = vmatprep.subr.bf16.mxu0 %v3196_v36  ;;  %v3246_v12 = vld [vmem:[#allocation2 + $0x4c4] ss:$16 sps:$4 sm:$0xff]   ;;  %v3244_v14 = vld [vmem:[#allocation2 + $0x4c0] ss:$16 sps:$4 sm:$0xff]  }
  0x48   : > { %1926 = vmatprep.subr.bf16.mxu1 %v3198_v37  ;;  %v3249_v13 = vld [vmem:[#allocation2 + $0x6c4] ss:$16 sps:$4 sm:$0xff]   ;;  %v3247_v15 = vld [vmem:[#allocation2 + $0x6c0] ss:$16 sps:$4 sm:$0xff]   ;;  %v3790_v37 = vpack.c.bf16 %v298_v34, %v298_v34  ;;  %v3352_v34 = vld [vmem:[#allocation2 + $0x88] ss:$16 sps:$4 sm:$0xff]  }
  0x49   : > { %v3252_v16 = vld [vmem:[#allocation2 + $0x4a4] ss:$16 sps:$4 sm:$0xff]   ;;  %v3250_v18 = vld [vmem:[#allocation2 + $0x4a0] ss:$16 sps:$4 sm:$0xff]  }
  0x4a   : > { %1886 = vmatpush2.bf16.msra.mxu0 %v3200_v38  ;;  %v3255_v17 = vld [vmem:[#allocation2 + $0x6a4] ss:$16 sps:$4 sm:$0xff]   ;;  %v3253_v19 = vld [vmem:[#allocation2 + $0x6a0] ss:$16 sps:$4 sm:$0xff]   ;;  %v300_v38 = vld [vmem:[%s3771_s8 + $0x38] sm:$0xff] }
  0x4b   : > { %1927 = vmatpush2.bf16.msra.mxu1 %v3201_v39  ;;  %1887 = vmatprep.subr.bf16.mxu0 %v3202_v40  ;;  %v3258_v20 = vld [vmem:[#allocation2 + $0x484] ss:$16 sps:$4 sm:$0xff]   ;;  %v3256_v22 = vld [vmem:[#allocation2 + $0x480] ss:$16 sps:$4 sm:$0xff]   ;;  %v3793_v40 = vpack.c.bf16 %v300_v38, %v300_v38  ;;  %v3363_v38 = vld [vmem:[#allocation2 + $0x26c] ss:$16 sps:$4 sm:$0xff]  }
  0x4c   : > { %1928 = vmatprep.subr.bf16.mxu1 %v3204_v41  ;;  %v3261_v21 = vld [vmem:[#allocation2 + $0x684] ss:$16 sps:$4 sm:$0xff]   ;;  %v3259_v23 = vld [vmem:[#allocation2 + $0x680] ss:$16 sps:$4 sm:$0xff]  }
  0x4d   : > { %v3264_v24 = vld [vmem:[#allocation2 + $0x464] ss:$16 sps:$4 sm:$0xff]   ;;  %v3262_v26 = vld [vmem:[#allocation2 + $0x460] ss:$16 sps:$4 sm:$0xff]  }
  0x4e   : > { %1888 = vmatpush2.bf16.msra.mxu0 %v3206_v42  ;;  %v3267_v25 = vld [vmem:[#allocation2 + $0x664] ss:$16 sps:$4 sm:$0xff]   ;;  %v3265_v27 = vld [vmem:[#allocation2 + $0x660] ss:$16 sps:$4 sm:$0xff]  }
  0x4f   : > { %1929 = vmatpush2.bf16.msra.mxu1 %v3207_v43  ;;  %1889 = vmatprep.subr.bf16.mxu0 %v3208_v44  ;;  %v3270_v28 = vld [vmem:[#allocation2 + $0x444] ss:$16 sps:$4 sm:$0xff]   ;;  %v3268_v30 = vld [vmem:[#allocation2 + $0x440] ss:$16 sps:$4 sm:$0xff]  }
  0x50   : > { %1930 = vmatprep.subr.bf16.mxu1 %v3210_v45  ;;  %v3273_v29 = vld [vmem:[#allocation2 + $0x644] ss:$16 sps:$4 sm:$0xff]   ;;  %v3271_v31 = vld [vmem:[#allocation2 + $0x640] ss:$16 sps:$4 sm:$0xff]  }
  0x51   : > { %v3276_v32 = vld [vmem:[#allocation2 + $0x424] ss:$16 sps:$4 sm:$0xff]   ;;  %v3274_v35 = vld [vmem:[#allocation2 + $0x420] ss:$16 sps:$4 sm:$0xff]  }
  0x52   : > { %1890 = vmatpush2.bf16.msra.mxu0 %v3212_v47  ;;  %v3279_v33 = vld [vmem:[#allocation2 + $0x624] ss:$16 sps:$4 sm:$0xff]   ;;  %v3277_v36 = vld [vmem:[#allocation2 + $0x620] ss:$16 sps:$4 sm:$0xff]  }
  0x53   : > { %1931 = vmatpush2.bf16.msra.mxu1 %v3213_v48  ;;  %1891 = vmatprep.subr.bf16.mxu0 %v3214_v51  ;;  %v3282_v39 = vld [vmem:[#allocation2 + $0x404] ss:$16 sps:$4 sm:$0xff]   ;;  %v3280_v42 = vld [vmem:[#allocation2 + $0x400] ss:$16 sps:$4 sm:$0xff]  }
  0x54   : > { %1932 = vmatprep.subr.bf16.mxu1 %v3216_v53  ;;  %v3285_v41 = vld [vmem:[#allocation2 + $0x604] ss:$16 sps:$4 sm:$0xff]   ;;  %v3283_v43 = vld [vmem:[#allocation2 + $0x600] ss:$16 sps:$4 sm:$0xff]  }
  0x55   : > { %v3288_v44 = vld [vmem:[#allocation2 + $0x5e4] ss:$16 sps:$4 sm:$0xff]   ;;  %v3286_v46 = vld [vmem:[#allocation2 + $0x5e0] ss:$16 sps:$4 sm:$0xff]  }
  0x56   : > { %1892 = vmatpush2.bf16.msra.mxu0 %v3218_v54  ;;  %v3291_v45 = vld [vmem:[#allocation2 + $0x7e4] ss:$16 sps:$4 sm:$0xff]   ;;  %v3289_v47 = vld [vmem:[#allocation2 + $0x7e0] ss:$16 sps:$4 sm:$0xff]  }
  0x57   : > { %1933 = vmatpush2.bf16.msra.mxu1 %v3219_v55  ;;  %1893 = vmatprep.subr.bf16.mxu0 %v3220_v56  ;;  %v3294_v48 = vld [vmem:[#allocation2 + $0x5c4] ss:$16 sps:$4 sm:$0xff]   ;;  %v3292_v51 = vld [vmem:[#allocation2 + $0x5c0] ss:$16 sps:$4 sm:$0xff]  }
  0x58   : > { %1934 = vmatprep.subr.bf16.mxu1 %v3222_v57  ;;  %v3297_v50 = vld [vmem:[#allocation2 + $0x7c4] ss:$16 sps:$4 sm:$0xff]   ;;  %v3295_v53 = vld [vmem:[#allocation2 + $0x7c0] ss:$16 sps:$4 sm:$0xff]  }
  0x59   : > { %v3300_v54 = vld [vmem:[#allocation2 + $0x5a4] ss:$16 sps:$4 sm:$0xff]   ;;  %v3298_v56 = vld [vmem:[#allocation2 + $0x5a0] ss:$16 sps:$4 sm:$0xff]  }
  0x5a   : > { %1894 = vmatpush2.bf16.msra.mxu0 %v3224_v58  ;;  %v3303_v55 = vld [vmem:[#allocation2 + $0x7a4] ss:$16 sps:$4 sm:$0xff]   ;;  %v3301_v57 = vld [vmem:[#allocation2 + $0x7a0] ss:$16 sps:$4 sm:$0xff]  }
  0x5b   : > { %1935 = vmatpush2.bf16.msra.mxu1 %v3225_v59  ;;  %1895 = vmatprep.subr.bf16.mxu0 %v3226_v60  ;;  %v3306_v58 = vld [vmem:[#allocation2 + $0x584] ss:$16 sps:$4 sm:$0xff]   ;;  %v3304_v60 = vld [vmem:[#allocation2 + $0x580] ss:$16 sps:$4 sm:$0xff]  }
  0x5c   : > { %1936 = vmatprep.subr.bf16.mxu1 %v3228_v61  ;;  %v3309_v59 = vld [vmem:[#allocation2 + $0x784] ss:$16 sps:$4 sm:$0xff]   ;;  %v3307_v61 = vld [vmem:[#allocation2 + $0x780] ss:$16 sps:$4 sm:$0xff]  }
  0x5d   : > { %v3316_v4 = vld [vmem:[#allocation2 + $0x540] ss:$16 sps:$4 sm:$0xff]  }
  0x5e   : > { %1896 = vmatpush2.bf16.msra.mxu0 %v3230_v62  ;;  %v3312_v62 = vld [vmem:[#allocation2 + $0x564] ss:$16 sps:$4 sm:$0xff]   ;;  %v3319_v5 = vld [vmem:[#allocation2 + $0x740] ss:$16 sps:$4 sm:$0xff]  }
  0x5f   : > { %1937 = vmatpush2.bf16.msra.mxu1 %v3231_v63  ;;  %1897 = vmatprep.subr.bf16.mxu0 %v3232_v0  ;;  %v3315_v63 = vld [vmem:[#allocation2 + $0x764] ss:$16 sps:$4 sm:$0xff]   ;;  %v3310_v0 = vld [vmem:[#allocation2 + $0x560] ss:$16 sps:$4 sm:$0xff]  }
  0x60   : > { %1938 = vmatprep.subr.bf16.mxu1 %v3234_v1  ;;  %v3313_v1 = vld [vmem:[#allocation2 + $0x760] ss:$16 sps:$4 sm:$0xff]  }
  0x62   : > { %1898 = vmatpush2.bf16.msra.mxu0 %v3236_v2  ;;  %v3318_v2 = vld [vmem:[#allocation2 + $0x544] ss:$16 sps:$4 sm:$0xff]  }
  0x63   : > { %1939 = vmatpush2.bf16.msra.mxu1 %v3237_v3  ;;  %1949 = vmatprep.subr.bf16.mxu0 %v3240_v6  ;;  %v3321_v3 = vld [vmem:[#allocation2 + $0x744] ss:$16 sps:$4 sm:$0xff]  }
  0x64   : > { %1990 = vmatprep.subr.bf16.mxu1 %v3243_v7  ;;  %v3324_v6 = vld [vmem:[#allocation2 + $0x524] ss:$16 sps:$4 sm:$0xff]  }
  0x65   : > { %1900 = vmatmul.mubr.bf16.vlgmr.msra.gmra.mxu0 %v3783_v8  ;;  %v3327_v7 = vld [vmem:[#allocation2 + $0x724] ss:$16 sps:$4 sm:$0xff]  }
  0x66   : > { %1941 = vmatmul.mubr.bf16.vlgmr.msra.gmra.mxu1 %v3785_v9  ;;  %1950 = vmatpush1.bf16.msra.mxu0 %v3238_v10  ;;  %v3322_v10 = vld [vmem:[#allocation2 + $0x520] ss:$16 sps:$4 sm:$0xff]  }
  0x67   : > { %1991 = vmatpush1.bf16.msra.mxu1 %v3241_v11  ;;  %1951 = vmatprep.subr.bf16.mxu0 %v3246_v12  ;;  %v3325_v11 = vld [vmem:[#allocation2 + $0x720] ss:$16 sps:$4 sm:$0xff]   ;;  %v3330_v12 = vld [vmem:[#allocation2 + $0x504] ss:$16 sps:$4 sm:$0xff]  }
  0x68   : > { %1992 = vmatprep.subr.bf16.mxu1 %v3249_v13  ;;  %1981 = vmatprep.mubr.bf16.mxu0 %v3790_v37  ;;  %v3333_v13 = vld [vmem:[#allocation2 + $0x704] ss:$16 sps:$4 sm:$0xff]  }
  0x69   : > { %2022 = vmatprep.mubr.bf16.mxu1 %v3793_v40 }
  0x6a   : > { %1952 = vmatpush1.bf16.msra.mxu0 %v3244_v14  ;;  %v3328_v14 = vld [vmem:[#allocation2 + $0x500] ss:$16 sps:$4 sm:$0xff]  }
  0x6b   : > { %1993 = vmatpush1.bf16.msra.mxu1 %v3247_v15  ;;  %1953 = vmatprep.subr.bf16.mxu0 %v3252_v16  ;;  %v3331_v15 = vld [vmem:[#allocation2 + $0x700] ss:$16 sps:$4 sm:$0xff]  }
  0x6c   : > { %1994 = vmatprep.subr.bf16.mxu1 %v3255_v17  ;;  %v297_v16 = vld [vmem:[%s3771_s8 + $0x20] sm:$0xff]  ;;  %v299_v17 = vld [vmem:[%s3771_s8 + $0x30] sm:$0xff] }
  0x6e   : > { %1954 = vmatpush1.bf16.msra.mxu0 %v3250_v18  ;;  %v3336_v18 = vld [vmem:[#allocation2 + $0xec] ss:$16 sps:$4 sm:$0xff]  }
  0x6f   : > { %1995 = vmatpush1.bf16.msra.mxu1 %v3253_v19  ;;  %1955 = vmatprep.subr.bf16.mxu0 %v3258_v20  ;;  %v3339_v19 = vld [vmem:[#allocation2 + $0x2ec] ss:$16 sps:$4 sm:$0xff]   ;;  %v3799_v20 = vpack.c.bf16 %v297_v16, %v297_v16 }
  0x70   : > { %1996 = vmatprep.subr.bf16.mxu1 %v3261_v21  ;;  %v3801_v21 = vpack.c.bf16 %v299_v17, %v299_v17  ;;  %v3420_v16 = vld [vmem:[#allocation2 + $0x12c] ss:$16 sps:$4 sm:$0xff]  }
  0x71   : > { %v3423_v17 = vld [vmem:[#allocation2 + $0x32c] ss:$16 sps:$4 sm:$0xff]  }
  0x72   : > { %1956 = vmatpush1.bf16.msra.mxu0 %v3256_v22  ;;  %v3334_v22 = vld [vmem:[#allocation2 + $0xe8] ss:$16 sps:$4 sm:$0xff]  }
  0x73   : > { %1997 = vmatpush1.bf16.msra.mxu1 %v3259_v23  ;;  %1957 = vmatprep.subr.bf16.mxu0 %v3264_v24  ;;  %v3337_v23 = vld [vmem:[#allocation2 + $0x2e8] ss:$16 sps:$4 sm:$0xff]   ;;  %v3342_v24 = vld [vmem:[#allocation2 + $0xcc] ss:$16 sps:$4 sm:$0xff]  }
  0x74   : > { %1998 = vmatprep.subr.bf16.mxu1 %v3267_v25  ;;  %v3345_v25 = vld [vmem:[#allocation2 + $0x2cc] ss:$16 sps:$4 sm:$0xff]  }
  0x76   : > { %1958 = vmatpush1.bf16.msra.mxu0 %v3262_v26  ;;  %v3340_v26 = vld [vmem:[#allocation2 + $0xc8] ss:$16 sps:$4 sm:$0xff]  }
  0x77   : > { %1999 = vmatpush1.bf16.msra.mxu1 %v3265_v27  ;;  %1959 = vmatprep.subr.bf16.mxu0 %v3270_v28  ;;  %v3343_v27 = vld [vmem:[#allocation2 + $0x2c8] ss:$16 sps:$4 sm:$0xff]   ;;  %v3348_v28 = vld [vmem:[#allocation2 + $0xac] ss:$16 sps:$4 sm:$0xff]  }
  0x78   : > { %2000 = vmatprep.subr.bf16.mxu1 %v3273_v29  ;;  %v3351_v29 = vld [vmem:[#allocation2 + $0x2ac] ss:$16 sps:$4 sm:$0xff]  }
  0x7a   : > { %1960 = vmatpush1.bf16.msra.mxu0 %v3268_v30  ;;  %v3346_v30 = vld [vmem:[#allocation2 + $0xa8] ss:$16 sps:$4 sm:$0xff]  }
  0x7b   : > { %2001 = vmatpush1.bf16.msra.mxu1 %v3271_v31  ;;  %1961 = vmatprep.subr.bf16.mxu0 %v3276_v32  ;;  %v3349_v31 = vld [vmem:[#allocation2 + $0x2a8] ss:$16 sps:$4 sm:$0xff]   ;;  %v3354_v32 = vld [vmem:[#allocation2 + $0x8c] ss:$16 sps:$4 sm:$0xff]  }
  0x7c   : > { %2002 = vmatprep.subr.bf16.mxu1 %v3279_v33  ;;  %v3357_v33 = vld [vmem:[#allocation2 + $0x28c] ss:$16 sps:$4 sm:$0xff]  }
  0x7e   : > { %1962 = vmatpush1.bf16.msra.mxu0 %v3274_v35  ;;  %v3355_v35 = vld [vmem:[#allocation2 + $0x288] ss:$16 sps:$4 sm:$0xff]  }
  0x7f   : > { %2003 = vmatpush1.bf16.msra.mxu1 %v3277_v36  ;;  %1963 = vmatprep.subr.bf16.mxu0 %v3282_v39  ;;  %v3360_v36 = vld [vmem:[#allocation2 + $0x6c] ss:$16 sps:$4 sm:$0xff]   ;;  %v3358_v39 = vld [vmem:[#allocation2 + $0x68] ss:$16 sps:$4 sm:$0xff]  }
  0x80   : > { %2004 = vmatprep.subr.bf16.mxu1 %v3285_v41  ;;  %v3369_v41 = vld [vmem:[#allocation2 + $0x24c] ss:$16 sps:$4 sm:$0xff]  }
  0x82   : > { %1964 = vmatpush1.bf16.msra.mxu0 %v3280_v42  ;;  %v3364_v42 = vld [vmem:[#allocation2 + $0x48] ss:$16 sps:$4 sm:$0xff]  }
  0x83   : > { %2005 = vmatpush1.bf16.msra.mxu1 %v3283_v43  ;;  %1965 = vmatprep.subr.bf16.mxu0 %v3288_v44  ;;  %v3367_v43 = vld [vmem:[#allocation2 + $0x248] ss:$16 sps:$4 sm:$0xff]   ;;  %v3372_v44 = vld [vmem:[#allocation2 + $0x2c] ss:$16 sps:$4 sm:$0xff]  }
  0x84   : > { %2006 = vmatprep.subr.bf16.mxu1 %v3291_v45  ;;  %v3375_v45 = vld [vmem:[#allocation2 + $0x22c] ss:$16 sps:$4 sm:$0xff]  }
  0x86   : > { %1966 = vmatpush2.bf16.msra.mxu0 %v3286_v46  ;;  %v3370_v46 = vld [vmem:[#allocation2 + $0x28] ss:$16 sps:$4 sm:$0xff]  }
  0x87   : > { %2007 = vmatpush2.bf16.msra.mxu1 %v3289_v47  ;;  %1967 = vmatprep.subr.bf16.mxu0 %v3294_v48  ;;  %v3373_v47 = vld [vmem:[#allocation2 + $0x228] ss:$16 sps:$4 sm:$0xff]   ;;  %v3378_v48 = vld [vmem:[#allocation2 + $0xc] ss:$16 sps:$4 sm:$0xff]  }
  0x88   : > { %2008 = vmatprep.subr.bf16.mxu1 %v3297_v50  ;;  %v3381_v50 = vld [vmem:[#allocation2 + $0x20c] ss:$16 sps:$4 sm:$0xff]  }
  0x8a   : > { %1968 = vmatpush2.bf16.msra.mxu0 %v3292_v51  ;;  %v3376_v51 = vld [vmem:[#allocation2 + $0x8] ss:$16 sps:$4 sm:$0xff]  }
  0x8b   : > { %2009 = vmatpush2.bf16.msra.mxu1 %v3295_v53  ;;  %1969 = vmatprep.subr.bf16.mxu0 %v3300_v54  ;;  %v3379_v53 = vld [vmem:[#allocation2 + $0x208] ss:$16 sps:$4 sm:$0xff]   ;;  %v3384_v54 = vld [vmem:[#allocation2 + $0x1ec] ss:$16 sps:$4 sm:$0xff]  }
  0x8c   : > { %2010 = vmatprep.subr.bf16.mxu1 %v3303_v55  ;;  %v3387_v55 = vld [vmem:[#allocation2 + $0x3ec] ss:$16 sps:$4 sm:$0xff]  }
  0x8e   : > { %1970 = vmatpush2.bf16.msra.mxu0 %v3298_v56  ;;  %v3382_v56 = vld [vmem:[#allocation2 + $0x1e8] ss:$16 sps:$4 sm:$0xff]  }
  0x8f   : > { %2011 = vmatpush2.bf16.msra.mxu1 %v3301_v57  ;;  %1971 = vmatprep.subr.bf16.mxu0 %v3306_v58  ;;  %v3385_v57 = vld [vmem:[#allocation2 + $0x3e8] ss:$16 sps:$4 sm:$0xff]   ;;  %v3390_v58 = vld [vmem:[#allocation2 + $0x1cc] ss:$16 sps:$4 sm:$0xff]  }
  0x90   : > { %2012 = vmatprep.subr.bf16.mxu1 %v3309_v59  ;;  %v3393_v59 = vld [vmem:[#allocation2 + $0x3cc] ss:$16 sps:$4 sm:$0xff]  }
  0x92   : > { %1972 = vmatpush2.bf16.msra.mxu0 %v3304_v60  ;;  %v3388_v60 = vld [vmem:[#allocation2 + $0x1c8] ss:$16 sps:$4 sm:$0xff]  }
  0x93   : > { %2013 = vmatpush2.bf16.msra.mxu1 %v3307_v61  ;;  %1973 = vmatprep.subr.bf16.mxu0 %v3312_v62  ;;  %v3391_v61 = vld [vmem:[#allocation2 + $0x3c8] ss:$16 sps:$4 sm:$0xff]   ;;  %v3396_v62 = vld [vmem:[#allocation2 + $0x1ac] ss:$16 sps:$4 sm:$0xff]  }
  0x94   : > { %2014 = vmatprep.subr.bf16.mxu1 %v3315_v63  ;;  %v3399_v63 = vld [vmem:[#allocation2 + $0x3ac] ss:$16 sps:$4 sm:$0xff]  }
  0x96   : > { %1974 = vmatpush2.bf16.msra.mxu0 %v3310_v0  ;;  %v3394_v0 = vld [vmem:[#allocation2 + $0x1a8] ss:$16 sps:$4 sm:$0xff]  }
  0x97   : > { %2015 = vmatpush2.bf16.msra.mxu1 %v3313_v1  ;;  %1975 = vmatprep.subr.bf16.mxu0 %v3318_v2  ;;  %v3397_v1 = vld [vmem:[#allocation2 + $0x3a8] ss:$16 sps:$4 sm:$0xff]   ;;  %v3402_v2 = vld [vmem:[#allocation2 + $0x18c] ss:$16 sps:$4 sm:$0xff]  }
  0x98   : > { %2016 = vmatprep.subr.bf16.mxu1 %v3321_v3  ;;  %v3405_v3 = vld [vmem:[#allocation2 + $0x38c] ss:$16 sps:$4 sm:$0xff]  }
  0x9a   : > { %1976 = vmatpush2.bf16.msra.mxu0 %v3316_v4  ;;  %v3400_v4 = vld [vmem:[#allocation2 + $0x188] ss:$16 sps:$4 sm:$0xff]  }
  0x9b   : > { %2017 = vmatpush2.bf16.msra.mxu1 %v3319_v5  ;;  %1977 = vmatprep.subr.bf16.mxu0 %v3324_v6  ;;  %v3403_v5 = vld [vmem:[#allocation2 + $0x388] ss:$16 sps:$4 sm:$0xff]   ;;  %v3408_v6 = vld [vmem:[#allocation2 + $0x16c] ss:$16 sps:$4 sm:$0xff]  }
  0x9c   : > { %2018 = vmatprep.subr.bf16.mxu1 %v3327_v7  ;;  %v3411_v7 = vld [vmem:[#allocation2 + $0x36c] ss:$16 sps:$4 sm:$0xff]  }
  0x9e   : > { %1978 = vmatpush2.bf16.msra.mxu0 %v3322_v10  ;;  %v3406_v10 = vld [vmem:[#allocation2 + $0x168] ss:$16 sps:$4 sm:$0xff]  }
  0x9f   : > { %2019 = vmatpush2.bf16.msra.mxu1 %v3325_v11  ;;  %1979 = vmatprep.subr.bf16.mxu0 %v3330_v12  ;;  %v3409_v11 = vld [vmem:[#allocation2 + $0x368] ss:$16 sps:$4 sm:$0xff]   ;;  %v3414_v12 = vld [vmem:[#allocation2 + $0x14c] ss:$16 sps:$4 sm:$0xff]  }
  0xa0   : > { %2020 = vmatprep.subr.bf16.mxu1 %v3333_v13  ;;  %v3417_v13 = vld [vmem:[#allocation2 + $0x34c] ss:$16 sps:$4 sm:$0xff]  }
  0xa2   : > { %1980 = vmatpush2.bf16.msra.mxu0 %v3328_v14  ;;  %v3412_v14 = vld [vmem:[#allocation2 + $0x148] ss:$16 sps:$4 sm:$0xff]  }
  0xa3   : > { %2021 = vmatpush2.bf16.msra.mxu1 %v3331_v15  ;;  %2031 = vmatprep.subr.bf16.mxu0 %v3336_v18  ;;  %v3415_v15 = vld [vmem:[#allocation2 + $0x348] ss:$16 sps:$4 sm:$0xff]  }
  0xa4   : > { %2072 = vmatprep.subr.bf16.mxu1 %v3339_v19  ;;  %v3418_v18 = vld [vmem:[#allocation2 + $0x128] ss:$16 sps:$4 sm:$0xff]  }
  0xa5   : > { %1982 = vmatmul.mubr.bf16.vlgmr.msra.gmra.mxu0 %v3799_v20  ;;  %v3421_v19 = vld [vmem:[#allocation2 + $0x328] ss:$16 sps:$4 sm:$0xff]  }
  0xa6   : > { %2023 = vmatmul.mubr.bf16.vlgmr.msra.gmra.mxu1 %v3801_v21  ;;  %2032 = vmatpush1.bf16.msra.mxu0 %v3334_v22  ;;  %v3426_v22 = vld [vmem:[#allocation2 + $0x10c] ss:$16 sps:$4 sm:$0xff]  }
  0xa7   : > { %2073 = vmatpush1.bf16.msra.mxu1 %v3337_v23  ;;  %2033 = vmatprep.subr.bf16.mxu0 %v3342_v24  ;;  %v3429_v23 = vld [vmem:[#allocation2 + $0x30c] ss:$16 sps:$4 sm:$0xff]   ;;  %v3424_v24 = vld [vmem:[#allocation2 + $0x108] ss:$16 sps:$4 sm:$0xff]  }
  0xa8   : > { %2074 = vmatprep.subr.bf16.mxu1 %v3345_v25  ;;  %2063 = vmatprep.mubr.bf16.mxu0 %v3774_v49  ;;  %v3361_v49 = vld [vmem:[#allocation2 + $0x268] ss:$16 sps:$4 sm:$0xff]  }
  0xa9   : > { %2104 = vmatprep.mubr.bf16.mxu1 %v3777_v52  ;;  %v3366_v52 = vld [vmem:[#allocation2 + $0x4c] ss:$16 sps:$4 sm:$0xff]   ;;  %v3427_v25 = vld [vmem:[#allocation2 + $0x308] ss:$16 sps:$4 sm:$0xff]  }
  0xaa   : > { %2034 = vmatpush1.bf16.msra.mxu0 %v3340_v26  ;;  %v3432_v26 = vld [vmem:[#allocation2 + $0x4ec] ss:$16 sps:$4 sm:$0xff]  }
  0xab   : > { %2075 = vmatpush1.bf16.msra.mxu1 %v3343_v27  ;;  %2035 = vmatprep.subr.bf16.mxu0 %v3348_v28  ;;  %v3435_v27 = vld [vmem:[#allocation2 + $0x6ec] ss:$16 sps:$4 sm:$0xff]   ;;  %v3430_v28 = vld [vmem:[#allocation2 + $0x4e8] ss:$16 sps:$4 sm:$0xff]  }
  0xac   : > { %2076 = vmatprep.subr.bf16.mxu1 %v3351_v29  ;;  %v3433_v29 = vld [vmem:[#allocation2 + $0x6e8] ss:$16 sps:$4 sm:$0xff]  }
  0xae   : > { %2036 = vmatpush1.bf16.msra.mxu0 %v3346_v30  ;;  %v3438_v30 = vld [vmem:[#allocation2 + $0x4cc] ss:$16 sps:$4 sm:$0xff]  }
  0xaf   : > { %2077 = vmatpush1.bf16.msra.mxu1 %v3349_v31  ;;  %2037 = vmatprep.subr.bf16.mxu0 %v3354_v32  ;;  %v3441_v31 = vld [vmem:[#allocation2 + $0x6cc] ss:$16 sps:$4 sm:$0xff]   ;;  %v3436_v32 = vld [vmem:[#allocation2 + $0x4c8] ss:$16 sps:$4 sm:$0xff]  }
  0xb0   : > { %2078 = vmatprep.subr.bf16.mxu1 %v3357_v33  ;;  %v3439_v33 = vld [vmem:[#allocation2 + $0x6c8] ss:$16 sps:$4 sm:$0xff]  }
  0xb2   : > { %2038 = vmatpush1.bf16.msra.mxu0 %v3352_v34  ;;  %v3444_v34 = vld [vmem:[#allocation2 + $0x4ac] ss:$16 sps:$4 sm:$0xff]  }
  0xb3   : > { %2079 = vmatpush1.bf16.msra.mxu1 %v3355_v35  ;;  %2039 = vmatprep.subr.bf16.mxu0 %v3360_v36  ;;  %v3447_v35 = vld [vmem:[#allocation2 + $0x6ac] ss:$16 sps:$4 sm:$0xff]   ;;  %v3442_v36 = vld [vmem:[#allocation2 + $0x4a8] ss:$16 sps:$4 sm:$0xff]  }
  0xb4   : > { %2080 = vmatprep.subr.bf16.mxu1 %v3363_v38  ;;  %v3445_v38 = vld [vmem:[#allocation2 + $0x6a8] ss:$16 sps:$4 sm:$0xff]  }
  0xb6   : > { %2040 = vmatpush1.bf16.msra.mxu0 %v3358_v39  ;;  %v3450_v39 = vld [vmem:[#allocation2 + $0x48c] ss:$16 sps:$4 sm:$0xff]  }
  0xb7   : > { %2081 = vmatpush1.bf16.msra.mxu1 %v3361_v49  ;;  %2041 = vmatprep.subr.bf16.mxu0 %v3366_v52  ;;  %v3451_v49 = vld [vmem:[#allocation2 + $0x688] ss:$16 sps:$4 sm:$0xff]   ;;  %v3456_v52 = vld [vmem:[#allocation2 + $0x46c] ss:$16 sps:$4 sm:$0xff]  }
  0xb8   : > { %2082 = vmatprep.subr.bf16.mxu1 %v3369_v41  ;;  %v3459_v41 = vld [vmem:[#allocation2 + $0x66c] ss:$16 sps:$4 sm:$0xff]  }
  0xba   : > { %2042 = vmatpush1.bf16.msra.mxu0 %v3364_v42  ;;  %v3454_v42 = vld [vmem:[#allocation2 + $0x468] ss:$16 sps:$4 sm:$0xff]  }
  0xbb   : > { %2083 = vmatpush1.bf16.msra.mxu1 %v3367_v43  ;;  %2043 = vmatprep.subr.bf16.mxu0 %v3372_v44  ;;  %v3465_v43 = vld [vmem:[#allocation2 + $0x64c] ss:$16 sps:$4 sm:$0xff]   ;;  %v3460_v44 = vld [vmem:[#allocation2 + $0x448] ss:$16 sps:$4 sm:$0xff]  }
  0xbc   : > { %2084 = vmatprep.subr.bf16.mxu1 %v3375_v45  ;;  %v3463_v45 = vld [vmem:[#allocation2 + $0x648] ss:$16 sps:$4 sm:$0xff]  }
  0xbe   : > { %2044 = vmatpush1.bf16.msra.mxu0 %v3370_v46  ;;  %v3468_v46 = vld [vmem:[#allocation2 + $0x42c] ss:$16 sps:$4 sm:$0xff]  }
  0xbf   : > { %2085 = vmatpush1.bf16.msra.mxu1 %v3373_v47  ;;  %2045 = vmatprep.subr.bf16.mxu0 %v3378_v48  ;;  %v3471_v47 = vld [vmem:[#allocation2 + $0x62c] ss:$16 sps:$4 sm:$0xff]   ;;  %v3466_v48 = vld [vmem:[#allocation2 + $0x428] ss:$16 sps:$4 sm:$0xff]  }
  0xc0   : > { %2086 = vmatprep.subr.bf16.mxu1 %v3381_v50  ;;  %v3469_v50 = vld [vmem:[#allocation2 + $0x628] ss:$16 sps:$4 sm:$0xff]  }
  0xc2   : > { %2046 = vmatpush1.bf16.msra.mxu0 %v3376_v51  ;;  %v3474_v51 = vld [vmem:[#allocation2 + $0x40c] ss:$16 sps:$4 sm:$0xff]  }
  0xc3   : > { %2087 = vmatpush1.bf16.msra.mxu1 %v3379_v53  ;;  %2047 = vmatprep.subr.bf16.mxu0 %v3384_v54  ;;  %v3477_v53 = vld [vmem:[#allocation2 + $0x60c] ss:$16 sps:$4 sm:$0xff]   ;;  %v3472_v54 = vld [vmem:[#allocation2 + $0x408] ss:$16 sps:$4 sm:$0xff]  }
  0xc4   : > { %2088 = vmatprep.subr.bf16.mxu1 %v3387_v55  ;;  %v3475_v55 = vld [vmem:[#allocation2 + $0x608] ss:$16 sps:$4 sm:$0xff]  }
  0xc6   : > { %2048 = vmatpush2.bf16.msra.mxu0 %v3382_v56  ;;  %v3480_v56 = vld [vmem:[#allocation2 + $0x5ec] ss:$16 sps:$4 sm:$0xff]  }
  0xc7   : > { %2089 = vmatpush2.bf16.msra.mxu1 %v3385_v57  ;;  %2049 = vmatprep.subr.bf16.mxu0 %v3390_v58  ;;  %v3483_v57 = vld [vmem:[#allocation2 + $0x7ec] ss:$16 sps:$4 sm:$0xff]   ;;  %v3478_v58 = vld [vmem:[#allocation2 + $0x5e8] ss:$16 sps:$4 sm:$0xff]  }
  0xc8   : > { %2090 = vmatprep.subr.bf16.mxu1 %v3393_v59  ;;  %v3481_v59 = vld [vmem:[#allocation2 + $0x7e8] ss:$16 sps:$4 sm:$0xff]  }
  0xca   : > { %2050 = vmatpush2.bf16.msra.mxu0 %v3388_v60  ;;  %v3486_v60 = vld [vmem:[#allocation2 + $0x5cc] ss:$16 sps:$4 sm:$0xff]  }
  0xcb   : > { %2091 = vmatpush2.bf16.msra.mxu1 %v3391_v61  ;;  %2051 = vmatprep.subr.bf16.mxu0 %v3396_v62  ;;  %v3489_v61 = vld [vmem:[#allocation2 + $0x7cc] ss:$16 sps:$4 sm:$0xff]   ;;  %v3484_v62 = vld [vmem:[#allocation2 + $0x5c8] ss:$16 sps:$4 sm:$0xff]  }
  0xcc   : > { %2092 = vmatprep.subr.bf16.mxu1 %v3399_v63  ;;  %v3487_v63 = vld [vmem:[#allocation2 + $0x7c8] ss:$16 sps:$4 sm:$0xff]  }
  0xce   : > { %2052 = vmatpush2.bf16.msra.mxu0 %v3394_v0  ;;  %v3492_v0 = vld [vmem:[#allocation2 + $0x5ac] ss:$16 sps:$4 sm:$0xff]  }
  0xcf   : > { %2093 = vmatpush2.bf16.msra.mxu1 %v3397_v1  ;;  %2053 = vmatprep.subr.bf16.mxu0 %v3402_v2  ;;  %v3495_v1 = vld [vmem:[#allocation2 + $0x7ac] ss:$16 sps:$4 sm:$0xff]   ;;  %v3490_v2 = vld [vmem:[#allocation2 + $0x5a8] ss:$16 sps:$4 sm:$0xff]  }
  0xd0   : > { %2094 = vmatprep.subr.bf16.mxu1 %v3405_v3  ;;  %v3493_v3 = vld [vmem:[#allocation2 + $0x7a8] ss:$16 sps:$4 sm:$0xff]  }
  0xd2   : > { %2054 = vmatpush2.bf16.msra.mxu0 %v3400_v4  ;;  %v3498_v4 = vld [vmem:[#allocation2 + $0x58c] ss:$16 sps:$4 sm:$0xff]  }
  0xd3   : > { %2095 = vmatpush2.bf16.msra.mxu1 %v3403_v5  ;;  %2055 = vmatprep.subr.bf16.mxu0 %v3408_v6  ;;  %v3501_v5 = vld [vmem:[#allocation2 + $0x78c] ss:$16 sps:$4 sm:$0xff]   ;;  %v3496_v6 = vld [vmem:[#allocation2 + $0x588] ss:$16 sps:$4 sm:$0xff]  }
  0xd4   : > { %2096 = vmatprep.subr.bf16.mxu1 %v3411_v7  ;;  %v3499_v7 = vld [vmem:[#allocation2 + $0x788] ss:$16 sps:$4 sm:$0xff]  }
  0xd6   : > { %2056 = vmatpush2.bf16.msra.mxu0 %v3406_v10  ;;  %v3504_v10 = vld [vmem:[#allocation2 + $0x56c] ss:$16 sps:$4 sm:$0xff]  }
  0xd7   : > { %2097 = vmatpush2.bf16.msra.mxu1 %v3409_v11  ;;  %2057 = vmatprep.subr.bf16.mxu0 %v3414_v12  ;;  %v3507_v11 = vld [vmem:[#allocation2 + $0x76c] ss:$16 sps:$4 sm:$0xff]   ;;  %v3502_v12 = vld [vmem:[#allocation2 + $0x568] ss:$16 sps:$4 sm:$0xff]  }
  0xd8   : > { %2098 = vmatprep.subr.bf16.mxu1 %v3417_v13  ;;  %v3505_v13 = vld [vmem:[#allocation2 + $0x768] ss:$16 sps:$4 sm:$0xff]  }
  0xda   : > { %2058 = vmatpush2.bf16.msra.mxu0 %v3412_v14  ;;  %v3510_v14 = vld [vmem:[#allocation2 + $0x54c] ss:$16 sps:$4 sm:$0xff]  }
  0xdb   : > { %2099 = vmatpush2.bf16.msra.mxu1 %v3415_v15  ;;  %2059 = vmatprep.subr.bf16.mxu0 %v3420_v16  ;;  %v3513_v15 = vld [vmem:[#allocation2 + $0x74c] ss:$16 sps:$4 sm:$0xff]   ;;  %v3508_v16 = vld [vmem:[#allocation2 + $0x548] ss:$16 sps:$4 sm:$0xff]  }
  0xdc   : > { %2100 = vmatprep.subr.bf16.mxu1 %v3423_v17  ;;  %v3511_v17 = vld [vmem:[#allocation2 + $0x748] ss:$16 sps:$4 sm:$0xff]  }
  0xde   : > { %2060 = vmatpush2.bf16.msra.mxu0 %v3418_v18  ;;  %v3516_v18 = vld [vmem:[#allocation2 + $0x52c] ss:$16 sps:$4 sm:$0xff]  }
  0xdf   : > { %2101 = vmatpush2.bf16.msra.mxu1 %v3421_v19  ;;  %2061 = vmatprep.subr.bf16.mxu0 %v3426_v22  ;;  %v3519_v19 = vld [vmem:[#allocation2 + $0x72c] ss:$16 sps:$4 sm:$0xff]   ;;  %v3514_v22 = vld [vmem:[#allocation2 + $0x528] ss:$16 sps:$4 sm:$0xff]  }
  0xe0   : > { %2102 = vmatprep.subr.bf16.mxu1 %v3429_v23  ;;  %v3517_v23 = vld [vmem:[#allocation2 + $0x728] ss:$16 sps:$4 sm:$0xff]  }
  0xe2   : > { %2062 = vmatpush2.bf16.msra.mxu0 %v3424_v24  ;;  %v3522_v24 = vld [vmem:[#allocation2 + $0x50c] ss:$16 sps:$4 sm:$0xff]  }
  0xe3   : > { %2103 = vmatpush2.bf16.msra.mxu1 %v3427_v25  ;;  %2113 = vmatprep.subr.bf16.mxu0 %v3432_v26  ;;  %v3525_v25 = vld [vmem:[#allocation2 + $0x70c] ss:$16 sps:$4 sm:$0xff]   ;;  %v3520_v26 = vld [vmem:[#allocation2 + $0x508] ss:$16 sps:$4 sm:$0xff]  }
  0xe4   : > { %2154 = vmatprep.subr.bf16.mxu1 %v3435_v27  ;;  %v3523_v27 = vld [vmem:[#allocation2 + $0x708] ss:$16 sps:$4 sm:$0xff]  }
  0xe5   : > { %2064 = vmatmul.mubr.bf16.vlgmr.msra.gmra.mxu0 %v3783_v8  ;;  %v3453_v8 = vld [vmem:[#allocation2 + $0x68c] ss:$16 sps:$4 sm:$0xff]  }
  0xe6   : > { %2105 = vmatmul.mubr.bf16.vlgmr.msra.gmra.mxu1 %v3785_v9  ;;  %2114 = vmatpush1.bf16.msra.mxu0 %v3430_v28  ;;  %v3448_v9 = vld [vmem:[#allocation2 + $0x488] ss:$16 sps:$4 sm:$0xff]  }
  0xe7   : > { %2155 = vmatpush1.bf16.msra.mxu1 %v3433_v29  ;;  %2115 = vmatprep.subr.bf16.mxu0 %v3438_v30  ;;  %v3526_v28 = vld [vmem:[%s3988_s3 + $0x78] sm:$0xff]   ;;  %v3528_v30 = vld [vmem:[%s3988_s3 + $0x70] sm:$0xff]  }
  0xe8   : > { %2156 = vmatprep.subr.bf16.mxu1 %v3441_v31  ;;  %2145 = vmatprep.mubr.bf16.mxu0 %v3790_v37  ;;  %v3457_v37 = vld [vmem:[#allocation2 + $0x668] ss:$16 sps:$4 sm:$0xff]  }
  0xe9   : > { %2186 = vmatprep.mubr.bf16.mxu1 %v3793_v40  ;;  %v3462_v40 = vld [vmem:[#allocation2 + $0x44c] ss:$16 sps:$4 sm:$0xff]  }
  0xea   : > { %2116 = vmatpush1.bf16.msra.mxu0 %v3436_v32  ;;  %v3527_v29 = vld [vmem:[%s3988_s3 + $0x38] sm:$0xff]  }
  0xeb   : > { %2157 = vmatpush1.bf16.msra.mxu1 %v3439_v33  ;;  %2117 = vmatprep.subr.bf16.mxu0 %v3444_v34  ;;  %v3529_v33 = vld [vmem:[%s3988_s3 + $0x30] sm:$0xff]  }
  0xec   : > { %2158 = vmatprep.subr.bf16.mxu1 %v3447_v35 }
  0xee   : > { %2118 = vmatpush1.bf16.msra.mxu0 %v3442_v36  ;;  %v3530_v36 = vld [vmem:[%s3988_s3 + $0x68] sm:$0xff]  }
  0xef   : > { %2159 = vmatpush1.bf16.msra.mxu1 %v3445_v38  ;;  %2119 = vmatprep.subr.bf16.mxu0 %v3450_v39 }
  0xf0   : > { %2160 = vmatprep.subr.bf16.mxu1 %v3453_v8 }
  0xf2   : > { %2120 = vmatpush1.bf16.msra.mxu0 %v3448_v9 }
  0xf3   : > { %2161 = vmatpush1.bf16.msra.mxu1 %v3451_v49  ;;  %2121 = vmatprep.subr.bf16.mxu0 %v3456_v52  ;;  %v3542_v49 = vld [vmem:[%s3988_s3 + $0xf8] sm:$0xff]  }
  0xf4   : > { %2162 = vmatprep.subr.bf16.mxu1 %v3459_v41  ;;  %v3543_v52 = vld [vmem:[%s3988_s3 + $0xb8] sm:$0xff]   ;;  %v3544_v41 = vld [vmem:[%s3988_s3 + $0xf0] sm:$0xff]  }
  0xf6   : > { %2122 = vmatpush1.bf16.msra.mxu0 %v3454_v42  ;;  %v3533_v42 = vld [vmem:[%s3988_s3 + $0x20] sm:$0xff]  }
  0xf7   : > { %2163 = vmatpush1.bf16.msra.mxu1 %v3457_v37  ;;  %2123 = vmatprep.subr.bf16.mxu0 %v3462_v40  ;;  %v3545_v37 = vld [vmem:[%s3988_s3 + $0xb0] sm:$0xff]   ;;  %v3534_v40 = vld [vmem:[%s3988_s3 + $0x58] sm:$0xff]  }
  0xf8   : > { %2164 = vmatprep.subr.bf16.mxu1 %v3465_v43  ;;  %v3546_v43 = vld [vmem:[%s3988_s3 + $0xe8] sm:$0xff]  }
  0xfa   : > { %2124 = vmatpush1.bf16.msra.mxu0 %v3460_v44  ;;  %v3535_v44 = vld [vmem:[%s3988_s3 + $0x18] sm:$0xff]  }
  0xfb   : > { %2165 = vmatpush1.bf16.msra.mxu1 %v3463_v45  ;;  %2125 = vmatprep.subr.bf16.mxu0 %v3468_v46  ;;  %v3547_v45 = vld [vmem:[%s3988_s3 + $0xa8] sm:$0xff]   ;;  %v3536_v46 = vld [vmem:[%s3988_s3 + $0x50] sm:$0xff]  }
  0xfc   : > { %2166 = vmatprep.subr.bf16.mxu1 %v3471_v47  ;;  %v3548_v47 = vld [vmem:[%s3988_s3 + $0xe0] sm:$0xff]  }
  0xfe   : > { %2126 = vmatpush1.bf16.msra.mxu0 %v3466_v48  ;;  %v3537_v48 = vld [vmem:[%s3988_s3 + $0x10] sm:$0xff]  }
  0xff   : > { %2167 = vmatpush1.bf16.msra.mxu1 %v3469_v50  ;;  %2127 = vmatprep.subr.bf16.mxu0 %v3474_v51  ;;  %v3549_v50 = vld [vmem:[%s3988_s3 + $0xa0] sm:$0xff]   ;;  %v3538_v51 = vld [vmem:[%s3988_s3 + $0x48] sm:$0xff]  }
 0x100   : > { %2168 = vmatprep.subr.bf16.mxu1 %v3477_v53  ;;  %v3550_v53 = vld [vmem:[%s3988_s3 + $0xd8] sm:$0xff]  }
 0x102   : > { %2128 = vmatpush1.bf16.msra.mxu0 %v3472_v54  ;;  %v3539_v54 = vld [vmem:[%s3988_s3 + $0x8] sm:$0xff]  }
 0x103   : > { %2169 = vmatpush1.bf16.msra.mxu1 %v3475_v55  ;;  %2129 = vmatprep.subr.bf16.mxu0 %v3480_v56  ;;  %v3551_v55 = vld [vmem:[%s3988_s3 + $0x98] sm:$0xff]   ;;  %v3540_v56 = vld [vmem:[%s3988_s3 + $0x40] sm:$0xff]  }
 0x104   : > { %2170 = vmatprep.subr.bf16.mxu1 %v3483_v57  ;;  %v3541_v57 = vld [vmem:[%s3988_s3] sm:$0xff]  }
 0x106   : > { %2130 = vmatpush2.bf16.msra.mxu0 %v3478_v58  ;;  %v567_v58 = vlaneseq }
 0x107   : > { %2171 = vmatpush2.bf16.msra.mxu1 %v3481_v59  ;;  %2131 = vmatprep.subr.bf16.mxu0 %v3486_v60 }
 0x108   : > { %2172 = vmatprep.subr.bf16.mxu1 %v3489_v61  ;;  %v568_v59 = vshrl.u32 %v567_v58, 7  ;;  %v565_v61 = vld [vmem:[%s3987_s2] sm:$0xf] }
 0x10a   : > { %2132 = vmatpush2.bf16.msra.mxu0 %v3484_v62  ;;  %v569_v60 = vsub.s32 0, %v568_v59  ;;  %v573_v62 = vsub.s32 1, %v568_v59 }
 0x10b   : > { %2173 = vmatpush2.bf16.msra.mxu1 %v3487_v63  ;;  %2133 = vmatprep.subr.bf16.mxu0 %v3492_v0 }
 0x10c   : > { %2174 = vmatprep.subr.bf16.mxu1 %v3495_v1  ;;  %v570_v63 = vrot.slane %v565_v61, %v569_v60  ;;  %v574_v0 = vrot.slane %v565_v61, %v573_v62 }
 0x10e   : > { %2134 = vmatpush2.bf16.msra.mxu0 %v3490_v2 }
 0x10f   : > { %2175 = vmatpush2.bf16.msra.mxu1 %v3493_v3  ;;  %2135 = vmatprep.subr.bf16.mxu0 %v3498_v4  ;;  %v3552_v3 = vld [vmem:[%s3988_s3 + $0xd0] sm:$0xff]  }
 0x110   : > { %2176 = vmatprep.subr.bf16.mxu1 %v3501_v5  ;;  %v3553_v5 = vld [vmem:[%s3988_s3 + $0x90] sm:$0xff]  }
 0x112   : > { %2136 = vmatpush2.bf16.msra.mxu0 %v3496_v6 }
 0x113   : > { %2177 = vmatpush2.bf16.msra.mxu1 %v3499_v7  ;;  %2137 = vmatprep.subr.bf16.mxu0 %v3504_v10 }
 0x114   : > { %2178 = vmatprep.subr.bf16.mxu1 %v3507_v11 }
 0x116   : > { %2138 = vmatpush2.bf16.msra.mxu0 %v3502_v12 }
 0x117   : > { %2179 = vmatpush2.bf16.msra.mxu1 %v3505_v13  ;;  %2139 = vmatprep.subr.bf16.mxu0 %v3510_v14  ;;  %v3554_v14 = vld [vmem:[%s3988_s3 + $0xc8] sm:$0xff]  }
 0x118   : > { %2180 = vmatprep.subr.bf16.mxu1 %v3513_v15 }
 0x11a   : > { %2140 = vmatpush2.bf16.msra.mxu0 %v3508_v16 }
 0x11b   : > { %2181 = vmatpush2.bf16.msra.mxu1 %v3511_v17  ;;  %2141 = vmatprep.subr.bf16.mxu0 %v3516_v18  ;;  %v3555_v17 = vld [vmem:[%s3988_s3 + $0x88] sm:$0xff]  }
 0x11c   : > { %2182 = vmatprep.subr.bf16.mxu1 %v3519_v19 }
 0x11e   : > { %2142 = vmatpush2.bf16.msra.mxu0 %v3514_v22 }
 0x11f   : > { %2183 = vmatpush2.bf16.msra.mxu1 %v3517_v23  ;;  %2143 = vmatprep.subr.bf16.mxu0 %v3522_v24 }
 0x120   : > { %2184 = vmatprep.subr.bf16.mxu1 %v3525_v25 }
 0x122   : > { %2144 = vmatpush2.bf16.msra.mxu0 %v3520_v26  ;;  %v3556_v26 = vld [vmem:[%s3988_s3 + $0xc0] sm:$0xff]  }
 0x123   : > { %2185 = vmatpush2.bf16.msra.mxu1 %v3523_v27  ;;  %3027 = vmatprep.subr.bf16.mxu0 %v3526_v28  ;;  %v3557_v28 = vld [vmem:[%s3988_s3 + $0x80] sm:$0xff]  }
 0x124   : > { %3049 = vmatprep.subr.bf16.mxu1 %v3542_v49 }
 0x125   : > { %v3820_v31 = vpop.f32.mrf.mxu0  ;;  %2146 = vmatmul.mubr.bf16.vlgmr.msra.gmra.mxu0 %v3799_v20  ;;  %v3531_v20 = vld [vmem:[%s3988_s3 + $0x28] sm:$0xff]  }
 0x126   : > { %v3822_v32 = vpop.f32.mrf.mxu1  ;;  %2187 = vmatmul.mubr.bf16.vlgmr.msra.gmra.mxu1 %v3801_v21  ;;  %3028 = vmatpush3.bf16.msra.mxu0 %v3527_v29  ;;  %v3532_v21 = vld [vmem:[%s3988_s3 + $0x60] sm:$0xff]   ;;  %v1902_v1 = vadd.f32 %v3820_v31, %v570_v63 }
 0x127   : > { %v1903_v34 = vpop.f32.mrf.mxu0  ;;  %3029 = vmatprep.subr.bf16.mxu0 %v3528_v30  ;;  %3050 = vmatpush3.bf16.msra.mxu1 %v3543_v52 }
 0x128   : > { %v3829_v35 = vpop.f32.mrf.mxu1  ;;  %3051 = vmatprep.subr.bf16.mxu1 %v3544_v41  ;;  %v1904_v2 = vadd.f32 %v1903_v34, %v574_v0  ;;  %v1943_v4 = vadd.f32 %v3822_v32, %v1902_v1  ;;  %v3560_v0 = vld [vmem:[%s3990_s5 + $0x8] sm:$0xff]  }
 0x129   : > { %v1905_v38 = vpop.f32.mrf.mxu0 }
 0x12a   : > { %v1946_v39 = vpop.f32.mrf.mxu1  ;;  %3030 = vmatpush3.bf16.msra.mxu0 %v3529_v33  ;;  %v1945_v10 = vadd.f32 %v3829_v35, %v1904_v2 }
 0x12b   : > { %v1906_v8 = vpop.f32.mrf.mxu0  ;;  %3031 = vmatprep.subr.bf16.mxu0 %v3530_v36  ;;  %3052 = vmatpush3.bf16.msra.mxu1 %v3545_v37 }
 0x12c   : > { %v1947_v9 = vpop.f32.mrf.mxu1  ;;  %3053 = vmatprep.subr.bf16.mxu1 %v3546_v43  ;;  %v577_v8 = vsub.s32 2, %v568_v59 }
 0x12d   : > { %v581_v9 = vsub.s32 3, %v568_v59 }
 0x12e   : > { %3032 = vmatpush3.bf16.msra.mxu0 %v3531_v20  ;;  %v3558_v20 = vld [vmem:[%s3990_s5 + $0x18] sm:$0xff]   ;;  %v578_v49 = vrot.slane %v565_v61, %v577_v8 }
 0x12f   : > { %3033 = vmatprep.subr.bf16.mxu0 %v3532_v21  ;;  %3054 = vmatpush3.bf16.msra.mxu1 %v3547_v45  ;;  %v3657_v21 = vmov 0.0   ;;  %v582_v52 = vrot.slane %v565_v61, %v581_v9  ;;  %v3559_v61 = vld [vmem:[%s3990_s5 + $0x10] sm:$0xff]  }
 0x130   : > { %3055 = vmatprep.subr.bf16.mxu1 %v3548_v47 }
 0x132   : > { %3034 = vmatpush3.bf16.msra.mxu0 %v3533_v42 }
 0x133   : > { %3035 = vmatprep.subr.bf16.mxu0 %v3534_v40  ;;  %3056 = vmatpush3.bf16.msra.mxu1 %v3549_v50 }
 0x134   : > { %3057 = vmatprep.subr.bf16.mxu1 %v3550_v53 }
 0x136   : > { %3036 = vmatpush3.bf16.msra.mxu0 %v3535_v44 }
 0x137   : > { %3037 = vmatprep.subr.bf16.mxu0 %v3536_v46  ;;  %3058 = vmatpush3.bf16.msra.mxu1 %v3551_v55 }
 0x138   : > { %3059 = vmatprep.subr.bf16.mxu1 %v3552_v3 }
 0x13a   : > { %3038 = vmatpush3.bf16.msra.mxu0 %v3537_v48 }
 0x13b   : > { %3039 = vmatprep.subr.bf16.mxu0 %v3538_v51  ;;  %3060 = vmatpush3.bf16.msra.mxu1 %v3553_v5  ;;  %v2983_v5 = vld [vmem:[%s3989_s4] ss:$0 sm:$0xff] }
 0x13c   : > { %3061 = vmatprep.subr.bf16.mxu1 %v3554_v14 }
 0x13e   : > { %3040 = vmatpush3.bf16.msra.mxu0 %v3539_v54 }
 0x13f   : > { %3041 = vmatprep.subr.bf16.mxu0 %v3540_v56  ;;  %3062 = vmatpush3.bf16.msra.mxu1 %v3555_v17  ;;  %v3016_v17 = vld [vmem:[%s3991_s6] ss:$0 sm:$0xff] }
 0x140   : > { %3063 = vmatprep.subr.bf16.mxu1 %v3556_v26 }
 0x142   : > { %3042 = vmatpush3.bf16.msra.mxu0 %v3541_v57 }
 0x143   : > { %3064 = vmatpush3.bf16.msra.mxu1 %v3557_v28  ;;  %3076 = vmatprep.subr.bf16.mxu0 %v3657_v21 }
 0x165   : > { %v1983_v6 = vpop.f32.mrf.mxu0 }
 0x166   : > { %v2024_v7 = vpop.f32.mrf.mxu1  ;;  %v1984_v11 = vadd.f32 %v1983_v6, %v1943_v4  ;;  %v3561_v4 = vld [vmem:[%s3990_s5] sm:$0xff]  }
 0x167   : > { %v1985_v12 = vpop.f32.mrf.mxu0 }
 0x168   : > { %v2026_v13 = vpop.f32.mrf.mxu1  ;;  %v2025_v15 = vadd.f32 %v2024_v7, %v1984_v11  ;;  %v1986_v16 = vadd.f32 %v1985_v12, %v1945_v10 }
 0x169   : > { %v1987_v18 = vpop.f32.mrf.mxu0 }
 0x16a   : > { %v2028_v19 = vpop.f32.mrf.mxu1  ;;  %v2027_v22 = vadd.f32 %v2026_v13, %v1986_v16  ;;  %v2195_v23 = vmax.f32 %v2025_v15, 0.0 }
 0x16b   : > { %v1988_v24 = vpop.f32.mrf.mxu0 }
 0x16c   : > { %v2029_v25 = vpop.f32.mrf.mxu1  ;;  %v2196_v27 = vmax.f32 %v2027_v22, 0.0  ;;  %v2199_v30 = vpack.c.bf16 %v2195_v23, %v2195_v23 }
 0x16e   : > { %v2200_v29 = vpack.c.bf16 %v2196_v27, %v2196_v27 }
 0x170   : > { %2498 = vmatprep.mubr.bf16.mxu0 %v2200_v29 }
 0x171   : > { %2499 = vmatmul.mubr.bf16.vlgmr.msra.gmra.mxu0 %v2199_v30 }
 0x172   : > { %3077 = vmatpush3.bf16.msra.mxu0 %v3558_v20  ;;  %3084 = vmatprep.mubr.msk.bf16.mxu0 %vm3658_vm0, %v3657_v21 }
 0x173   : > { %3078 = vmatprep.subr.bf16.mxu0 %v3657_v21 }
 0x176   : > { %3079 = vmatpush3.bf16.msra.mxu0 %v3559_v61 }
 0x177   : > { %3080 = vmatprep.subr.bf16.mxu0 %v3657_v21 }
 0x17a   : > { %3081 = vmatpush3.bf16.msra.mxu0 %v3560_v0 }
 0x17b   : > { %3082 = vmatprep.subr.bf16.mxu0 %v3657_v21 }
 0x17e   : > { %3083 = vmatpush3.bf16.msra.mxu0 %v3561_v4 }
 0x1a5   : > { %v2065_v31 = vpop.f32.mrf.mxu0 }
 0x1a6   : > { %v2106_v32 = vpop.f32.mrf.mxu1  ;;  %v2066_v41 = vadd.f32 %v2065_v31, %v578_v49 }
 0x1a7   : > { %v2067_v33 = vpop.f32.mrf.mxu0 }
 0x1a8   : > { %v2108_v34 = vpop.f32.mrf.mxu1  ;;  %v2068_v42 = vadd.f32 %v2067_v33, %v582_v52  ;;  %v2107_v37 = vadd.f32 %v2106_v32, %v2066_v41 }
 0x1a9   : > { %v2069_v35 = vpop.f32.mrf.mxu0 }
 0x1aa   : > { %v2110_v36 = vpop.f32.mrf.mxu1  ;;  %v2109_v44 = vadd.f32 %v2108_v34, %v2068_v42 }
 0x1ab   : > { %v2070_v38 = vpop.f32.mrf.mxu0 }
 0x1ac   : > { %v2111_v39 = vpop.f32.mrf.mxu1 }
 0x1e5   : > { %v2147_v40 = vpop.f32.mrf.mxu0 }
 0x1e6   : > { %v2188_v43 = vpop.f32.mrf.mxu1  ;;  %v2148_v45 = vadd.f32 %v2147_v40, %v2107_v37 }
 0x1e7   : > { %v2149_v46 = vpop.f32.mrf.mxu0 }
 0x1e8   : > { %v2190_v47 = vpop.f32.mrf.mxu1  ;;  %v2189_v48 = vadd.f32 %v2188_v43, %v2148_v45  ;;  %v2150_v50 = vadd.f32 %v2149_v46, %v2109_v44 }
 0x1e9   : > { %v2151_v51 = vpop.f32.mrf.mxu0 }
 0x1ea   : > { %v2192_v53 = vpop.f32.mrf.mxu1  ;;  %v2191_v54 = vadd.f32 %v2190_v47, %v2150_v50  ;;  %v2197_v55 = vmax.f32 %v2189_v48, 0.0 }
 0x1eb   : > { %v2152_v56 = vpop.f32.mrf.mxu0 }
 0x1ec   : > { %v2193_v57 = vpop.f32.mrf.mxu1  ;;  %v2198_v58 = vmax.f32 %v2191_v54, 0.0  ;;  %v2201_v60 = vpack.c.bf16 %v2197_v55, %v2197_v55 }
 0x1ee   : > { %v2202_v59 = vpack.c.bf16 %v2198_v58, %v2198_v58 }
 0x1f0   : > { %2538 = vmatprep.mubr.bf16.mxu1 %v2202_v59 }
 0x1f1   : > { %2539 = vmatmul.mubr.bf16.vlgmr.msra.gmra.mxu1 %v2201_v60 }
 0x231   : > { %v3043_v62 = vpop.f32.mrf.mxu0 }
 0x233   : > { %v3044_v63 = vpop.f32.mrf.mxu0 }
 0x234   : > { %v3045_v1 = vadd.f32 %v3044_v63, %v3043_v62 }
 0x235   : > { %v3046_v2 = vpop.f32.mrf.mxu0 }
 0x236   : > { %v2501_v10 = vadd.f32 %v3045_v1, %v2983_v5 }
 0x237   : > { %v3047_v3 = vpop.f32.mrf.mxu0 }
 0x2b1   : > { %v3065_v6 = vpop.f32.mrf.mxu1 }
 0x2b3   : > { %v3066_v7 = vpop.f32.mrf.mxu1 }
 0x2b4   : > { %v3067_v11 = vadd.f32 %v3066_v7, %v3065_v6 }
 0x2b5   : > { %v3068_v12 = vpop.f32.mrf.mxu1 }
 0x2b6   : > { %v2541_v13 = vadd.f32 %v3067_v11, %v2501_v10 }
 0x2b7   : > { %v3069_v14 = vpop.f32.mrf.mxu1 }
 0x2b8   : > { %v2546_v15 = vmax.f32 %v2541_v13, 0.0 }
 0x2ba   : > { %v2547_v16 = vpack.c.bf16 %v2546_v15, %v2546_v15 }
 0x2bc   : > { %3085 = vmatmul.mubr.msk.bf16.vlgmr.msra.gmra.mxu0 %vm2587_vm1, %v2547_v16 }
 0x37c   : > { %v2625_v18 = vpop.f32.mrf.mxu0 }
 0x37d   : > { %v2626_v19 = vadd.f32 %v3016_v17, %v2625_v18 }
 0x37e   : > { %v3086_v22 = vpop.f32.mrf.mxu0 }
 0x37f   : > { %v2631_v23 = vpack.c.bf16 %v2626_v19, %v2626_v19 }
 0x380   : > { %v2628_v24 = vpop.f32.mrf.mxu0 }
 0x381   : > { %2632 = vst [vmem:[%s286_s23] sm:$0xf] %v2631_v23 }
 0x382   : > { %v3087_v25 = vpop.f32.mrf.mxu0 }
 0x383   : > { %3601 = shalt.err (!%p3598_p0)
}
 0x384   : > { %s3602_s19 = scalar_lea.hbm %s3944_s13, 64  ;;  %s3606_s21 = scalar_lea.hbm %s3992_s7, 128 }
 0x385   : > { %p3603_p1 = scmp.ne.s32.totalorder %s3944_s13, %s3602_s19  ;;  %p3607_p4 = scmp.lt.s32.totalorder %s3944_s13, %s3992_s7 }
 0x386   : > { %p3608_p7 = scmp.lt.s32.totalorder %s3606_s21, %s3602_s19 }
 0x387   : > { %p3604_p2 = pnand %p3603_p1, %p3738_p5 }
 0x388   : > { %p3609_p6 = por %p3608_p7, %p3607_p4 }
 0x389   : > { %p3605_p3 = pneg %p3604_p2 }
 0x38b   : > { %p3610_p8 = pnand %p3609_p6, %p3605_p3 }
 0x38d   : > { %3613 = shalt.err (!%p3610_p8)
}
 0x38e   : > { %3092 = dma.vmem_to_hbm [thread:$0]  (%p3738_p5), %s3946_s29, 64, %s3944_s13, %s2634_s14  }
 0x38f PF: > { %p3104_p9 = scmp.ge.s32.totalorder %s3652_s27, 2  ;;  %s2659_s8 = sand.u32 1, %s3640_s24  }
 0x390   : > { %p3996_p10 = scmp.ne.s32.totalorder %s3994_s12, 0  ;;  %s2660_s9 = scalar_lea.sflag [#allocation4], %s2659_s8 }
 0x392   : > { %p3099_p11 = pnand %p3104_p9, %p3996_p10 }
 0x394   : > { %p3100_p12 = pneg %p3099_p11 }
 0x396   : > { %3635 = dma.done.wait (%p3100_p12), %s2660_s9, 64  }
 0x397   : > { %3637 = vsyncadd (%p3100_p12), %s2660_s9, 4294967232  ;;  %p18_p13 = scmp.ge.s32.totalorder %s3725_s30, 4   ;;  %s3997_s24 = smov %s3644_s25 }
 0x398   : > { %s3998_s25 = smov %s3648_s26  ;;  %s3999_s26 = smov %s3736_s10 }
 0x399   : > { %s4000_s27 = smov %s3725_s30  ;;  %20 = sbr.rel (!%p18_p13) target bundleno = 4 (0x4), region = 88 }
 0x39e   :  { %2665 = vsyncpa [#allocation3], 1 }
 0x39f   :  { %2667 = vsyncpa [#allocation3 + $0x1], 1 }
 0x3a0   :  { %2668 = vsyncpa [#allocation4], 1 }
 0x3a1   :  { %2670 = vsyncpa [#allocation4 + $0x1], 1 }

</bundles_post_ra>
